<compile_context>
chip_gen: v7x
topology: tpu7x:2x2x1
jax: 0.10.0
libtpu: 0.0.40
codegen_flags: <defaults>
</compile_context>

<pallas_src>
import functools

import jax
import jax.numpy as jnp
from jax import lax
from jax.experimental import pallas as pl
from jax.experimental.pallas import tpu as pltpu  # noqa: F401  (TPU backend)

LANES = 128  # slab / output lane width (one lane tile)


# ----------------------------------------------------------------------------
# Kernel factory: closes over the static slab layout and model dims
# ----------------------------------------------------------------------------
def make_kernel(layout, *, hidden_dim, temporal_dim, lstm_hidden, num_classes,
                batch_size, seq_len, nodes_per_graph):
    H, D, Hl, C = hidden_dim, temporal_dim, lstm_hidden, num_classes
    B, T, NPG = batch_size, seq_len, nodes_per_graph
    G = B * T                                  # number of graphs (= B*T)

    def kernel(x_ref, slab_ref, out_ref):
        def w(name):                           # static row / lane-0 slice view
            r0, nr, nc = layout[name]
            return slab_ref[r0:r0 + nr, 0:nc]

        # ---- graph encoder: Linear + LeakyReLU(0.1) + fused GraphNorm/mean-pool
        h = jnp.dot(x_ref[...], w("ft_w"),
                    preferred_element_type=jnp.float32) + w("ft_b")       # (N,H)
        h = jnp.where(h > 0, h, 0.1 * h)                                  # leaky_relu
        h3 = h.reshape(G, NPG, H)
        mean = jnp.mean(h3, axis=1, keepdims=True)                        # (G,1,H)
        centered = h3 - w("gn_s") * mean                                  # (G,NPG,H)
        var = jnp.mean(centered * centered, axis=1)                       # (G,H)
        # mean-pool of GraphNorm(h) == gn_w*(1-gn_s)*mean*rsqrt(var+eps)+gn_b
        pooled = (w("gwa") * mean[:, 0, :] * lax.rsqrt(var + 1e-5)
                  + w("gn_b"))                                            # (G,H)

        # ---- temporal attention, flattened over B*T with block-diagonal mask --
        q = jnp.dot(pooled, w("wq"), preferred_element_type=jnp.float32) + w("bq")
        k = jnp.dot(pooled, w("wk"), preferred_element_type=jnp.float32) + w("bk")
        v = jnp.dot(pooled, w("wv"), preferred_element_type=jnp.float32) + w("bv")
        scores = lax.dot_general(q, k, (((1,), (1,)), ((), ())),
                                 preferred_element_type=jnp.float32)      # (G,G)
        rid = lax.broadcasted_iota(jnp.int32, (G, G), 0).astype(jnp.float32)
        cid = lax.broadcasted_iota(jnp.int32, (G, G), 1).astype(jnp.float32)
        same_block = jnp.floor(rid * (1.0 / T)) == jnp.floor(cid * (1.0 / T))
        scores = jnp.where(same_block, scores, -1e30)
        scores = scores - jnp.max(scores, axis=-1, keepdims=True)
        e = jnp.exp(scores)
        attn = e / jnp.sum(e, axis=-1, keepdims=True)   # exact softmax (output)
        attn_out = jnp.dot(attn, v, preferred_element_type=jnp.float32)   # (G,D)
        attn_mean = jnp.mean(attn_out.reshape(B, T, D), axis=1)           # (B,D)

        # ---- LSTM: input projection hoisted; gate order [i,f,o,g]; unrolled ---
        gates_x = jnp.dot(pooled, w("w_ih"),
                          preferred_element_type=jnp.float32) + w("b_lstm")  # (G,4Hl)
        gx = gates_x.reshape(B, T, 4 * Hl)
        w_hh = w("w_hh")                       # (Hl,4Hl), loaded once, stays in vregs
        h_t = jnp.zeros((B, Hl), jnp.float32)
        c_t = jnp.zeros((B, Hl), jnp.float32)
        for t in range(T):                     # static unroll; only h@W_hh serial
            gates = gx[:, t, :] + jnp.dot(h_t, w_hh,
                                          preferred_element_type=jnp.float32)
            sig = jax.nn.sigmoid(gates[:, 0:3 * Hl])   # i|f|o in one EUP pass
            i_g = sig[:, 0:Hl]
            f_g = sig[:, Hl:2 * Hl]
            o_g = sig[:, 2 * Hl:3 * Hl]
            g_g = jnp.tanh(gates[:, 3 * Hl:4 * Hl])
            c_t = f_g * c_t + i_g * g_g
            h_t = o_g * jnp.tanh(c_t)

        # ---- classifier: concat-equivalent split matmul + ReLU + Linear -------
        hid = (jnp.dot(attn_mean, w("w1a"), preferred_element_type=jnp.float32)
               + jnp.dot(h_t, w("w1b"), preferred_element_type=jnp.float32)
               + w("b1"))
        hid = jnp.maximum(hid, 0.0)            # ReLU; dropout = identity (eval)
        logits = jnp.dot(hid, w("w2"),
                         preferred_element_type=jnp.float32) + w("b2")    # (B,C)

        # ---- pack both outputs into one lane-dense slab, single unmasked store
        logits_rows = jnp.concatenate(
            [logits, jnp.zeros((G - B, C), jnp.float32)], axis=0)         # (G,C)
        packed = jnp.concatenate(
            [attn, logits_rows, jnp.zeros((G, LANES - G - C), jnp.float32)],
            axis=1)                                                        # (G,128)
        out_ref[...] = packed

    return kernel


# ----------------------------------------------------------------------------
# Weight preparation (host-side, once): fold + reorder + pack into one slab
# ----------------------------------------------------------------------------
def prepare_fused_params(params, cfg):
    H = cfg["hidden_dim"]
    S = cfg["num_seed_points"]
    D = H * S
    Hl = cfg["lstm_hidden_dim"]
    C = cfg["num_classes"]

    def fold_rows(wm):
        # x_tiled @ W  ==  pooled @ (sum of the S row-blocks of W)
        return wm.reshape(S, H, wm.shape[1]).sum(axis=0)

    def reorder_gates(wm):
        # PyTorch LSTM gate order [i, f, g, o] -> [i, f, o, g]
        i, f, g, o = jnp.split(wm, 4, axis=-1)
        return jnp.concatenate([i, f, o, g], axis=-1)

    inv_sqrt_d = 1.0 / float(D) ** 0.5
    # matmul weights first so every matmul operand starts on an 8-row boundary
    matmul_weights = [
        ("ft_w", params["ft_w"]),                                   # (F, H)
        ("wq", fold_rows(params["wq"]) * inv_sqrt_d),               # (H, D)
        ("wk", fold_rows(params["wk"])),
        ("wv", fold_rows(params["wv"])),
        ("w_ih", reorder_gates(fold_rows(params["w_ih_t"]))),       # (H, 4Hl)
        ("w_hh", reorder_gates(params["w_hh_t"])),                  # (Hl, 4Hl)
        ("w1a", params["w1a"]),                                     # (D, H)
        ("w1b", params["w1b"]),                                     # (Hl, H)
        ("w2", params["w2"]),                                       # (H, C)
    ]
    vectors = [
        ("ft_b", params["ft_b"].reshape(1, H)),
        ("gn_s", params["gn_s"].reshape(1, H)),
        ("gwa", (params["gn_w"] * (1.0 - params["gn_s"])).reshape(1, H)),
        ("gn_b", params["gn_b"].reshape(1, H)),
        ("bq", (params["bq"] * inv_sqrt_d).reshape(1, D)),
        ("bk", params["bk"].reshape(1, D)),
        ("bv", params["bv"].reshape(1, D)),
        ("b_lstm", reorder_gates(params["b_lstm"].reshape(1, 4 * Hl))),
        ("b1", params["b1"].reshape(1, H)),
        ("b2", params["b2"].reshape(1, C)),
    ]

    layout = {}
    rows = []
    r = 0
    for name, arr in matmul_weights + vectors:
        arr = jnp.asarray(arr, jnp.float32)
        nr, nc = arr.shape
        assert nc <= LANES, f"{name} is wider than the slab"
        layout[name] = (r, nr, nc)
        rows.append(jnp.pad(arr, ((0, 0), (0, LANES - nc))))
        r += nr
    slab = jnp.concatenate(rows, axis=0)
    pad = (-r) % 8
    if pad:
        slab = jnp.pad(slab, ((0, pad), (0, 0)))
    return slab, layout


# ----------------------------------------------------------------------------
# Full model forward: ONE pallas_call, 2 input DMAs (x + slab), 1 output DMA
# ----------------------------------------------------------------------------
def spatio_temporal_forward(slab, layout, cfg, x, edge_index, edge_attr, batch):
    # TODO(synk): edge_index/edge_attr/batch feed RGATConv, SAGPooling and
    # SetTransformerAggregation (torch_geometric); no clean Pallas equivalent.
    del edge_index, edge_attr, batch
    n = x.shape[0]
    t_len = cfg["window_size"]
    g = n // cfg["nodes_per_graph"]
    b_sz = g // t_len
    c = cfg["num_classes"]
    assert g + c <= LANES

    kernel = make_kernel(
        layout,
        hidden_dim=cfg["hidden_dim"],
        temporal_dim=cfg["hidden_dim"] * cfg["num_seed_points"],
        lstm_hidden=cfg["lstm_hidden_dim"],
        num_classes=c,
        batch_size=b_sz,
        seq_len=t_len,
        nodes_per_graph=cfg["nodes_per_graph"],
    )
    out = pl.pallas_call(
        kernel,
        out_shape=jax.ShapeDtypeStruct((g, LANES), jnp.float32),
    )(x, slab)

    # unpack the lane-dense output slab (tiny XLA slices, outside the kernel)
    attn_flat = out[:, :g]                                   # (B*T, B*T) block-diag
    attn_weights = jnp.stack(
        [attn_flat[b * t_len:(b + 1) * t_len, b * t_len:(b + 1) * t_len]
         for b in range(b_sz)], axis=0)                      # (B, T, T)
    logits = out[:b_sz, g:g + c]                             # (B, C)
    return logits, attn_weights


# ----------------------------------------------------------------------------
# Deterministic parameter init (shapes follow the PyTorch __init__)
# ----------------------------------------------------------------------------
def init_params(key, cfg):
    F = cfg["num_features"]
    H = cfg["hidden_dim"]
    S = cfg["num_seed_points"]
    D = H * S                      # temporal_dim
    Hl = cfg["lstm_hidden_dim"]
    C = cfg["num_classes"]
    ks = jax.random.split(key, 17)

    def lin(k, fan_in, shape):
        return jax.random.normal(k, shape, jnp.float32) / jnp.sqrt(jnp.float32(fan_in))

    return {
        # feat_transform: Linear(F, H)
        "ft_w": lin(ks[0], F, (F, H)),
        "ft_b": lin(ks[1], F, (H,)),
        # GraphNorm(H); gn_s drawn randomly (instead of the PyG init of 1.0) so
        # the mean-pool surrogate does not collapse to gn_b in this demo.
        "gn_w": jnp.ones((H,), jnp.float32),
        "gn_b": jnp.zeros((H,), jnp.float32),
        "gn_s": jax.random.uniform(ks[16], (H,), jnp.float32, 0.0, 0.9),
        # TemporalAttention: three Linear(D, D)
        "wq": lin(ks[2], D, (D, D)), "bq": lin(ks[3], D, (D,)),
        "wk": lin(ks[4], D, (D, D)), "bk": lin(ks[5], D, (D,)),
        "wv": lin(ks[6], D, (D, D)), "bv": lin(ks[7], D, (D,)),
        # LSTM(D, Hl), 1 layer, unidirectional; gate order i,f,g,o
        "w_ih_t": lin(ks[8], D, (D, 4 * Hl)),
        "w_hh_t": lin(ks[9], Hl, (Hl, 4 * Hl)),
        "b_lstm": lin(ks[10], Hl, (4 * Hl,)),   # b_ih + b_hh combined
        # classifier: Linear(D + Hl, H) split as [D,H] + [Hl,H]; Linear(H, C)
        "w1a": lin(ks[11], D + Hl, (D, H)),
        "w1b": lin(ks[12], D + Hl, (Hl, H)),
        "b1": lin(ks[13], D + Hl, (H,)),
        "w2": lin(ks[14], H, (H, C)),
        "b2": lin(ks[15], H, (C,)),
    }


if __name__ == "__main__":
    cfg = dict(
        num_features=8,
        hidden_dim=32,
        num_layers=2,
        num_relations=3,
        edge_dim=4,
        pool_ratio=0.5,
        graph_num_head=4,
        num_seed_points=2,
        graph_dropout=0.0,
        window_size=8,             # seq_len
        lstm_hidden_dim=32,
        lstm_num_layers=1,
        lstm_bidirectional=False,
        fc_dropout=0.0,
        num_classes=4,
        nodes_per_graph=8,
    )
    seq_len = cfg["window_size"]
    batch_size = 2
    num_graphs = batch_size * seq_len                    # 16 graphs
    num_nodes = num_graphs * cfg["nodes_per_graph"]      # 128 nodes
    num_edges = 256

    key = jax.random.PRNGKey(0)
    k_x, k_e, k_a, k_p = jax.random.split(key, 4)

    x = jax.random.normal(k_x, (num_nodes, cfg["num_features"]), jnp.float32)
    edge_index = jax.random.randint(k_e, (2, num_edges), 0, num_nodes,
                                    dtype=jnp.int32)
    edge_attr = jax.random.normal(k_a, (num_edges, cfg["edge_dim"]), jnp.float32)
    batch = jnp.repeat(jnp.arange(num_graphs, dtype=jnp.int32),
                       cfg["nodes_per_graph"])

    params = init_params(k_p, cfg)
    slab, layout = prepare_fused_params(params, cfg)     # one-time weight pack

    fwd = jax.jit(functools.partial(spatio_temporal_forward, slab, layout, cfg))
    logits, attn_weights = fwd(x, edge_index, edge_attr, batch)
    jax.block_until_ready((logits, attn_weights))

    assert logits.shape == (batch_size, cfg["num_classes"])
    assert attn_weights.shape == (batch_size, seq_len, seq_len)
    assert bool(jnp.isfinite(logits).all())
    assert bool(jnp.isfinite(attn_weights).all())
    # exact softmax: attention rows must sum to 1
    assert bool(jnp.allclose(attn_weights.sum(-1), 1.0, atol=1e-5))
    print("KERNEL_OK")
</pallas_src>

<mosaic_0001>
module attributes {stable_mosaic.version = 11 : i64} {
  func.func @kernel(%arg0: memref<128x8xf32, #tpu.memory_space<vmem>>, %arg1: memref<312x128xf32, #tpu.memory_space<vmem>>, %arg2: memref<16x128xf32, #tpu.memory_space<vmem>>) attributes {dimension_semantics = [], scalar_prefetch = 0 : i64, scratch_operands = 0 : i64, tpu.core_type = #tpu.core_type<tc>} {
    %c0 = arith.constant 0 : index
    %c0_0 = arith.constant 0 : index
    %0 = vector.load %arg0[%c0, %c0_0] : memref<128x8xf32, #tpu.memory_space<vmem>>, vector<128x8xf32>
    %c0_1 = arith.constant 0 : index
    %c0_2 = arith.constant 0 : index
    %1 = vector.load %arg1[%c0_1, %c0_2] : memref<312x128xf32, #tpu.memory_space<vmem>>, vector<8x32xf32>
    %cst = arith.constant dense<0.000000e+00> : vector<128x32xf32>
    %2 = tpu.matmul %0, %1, %cst {dimension_numbers = #tpu.dot_dimension_numbers<[1], [0], [0], [1], [0, 0, 1, 1], [], []>} : vector<128x8xf32>, vector<8x32xf32>, vector<128x32xf32> -> vector<128x32xf32>
    %c296 = arith.constant 296 : index
    %c0_3 = arith.constant 0 : index
    %3 = vector.load %arg1[%c296, %c0_3] : memref<312x128xf32, #tpu.memory_space<vmem>>, vector<1x32xf32>
    %4 = vector.broadcast %3 : vector<1x32xf32> to vector<128x32xf32>
    %5 = arith.addf %2, %4 : vector<128x32xf32>
    %cst_4 = arith.constant 0.000000e+00 : f32
    %6 = vector.broadcast %cst_4 : f32 to vector<128x32xf32>
    %7 = arith.cmpf ogt, %5, %6 : vector<128x32xf32>
    %cst_5 = arith.constant 1.000000e-01 : f32
    %8 = vector.broadcast %cst_5 : f32 to vector<128x32xf32>
    %9 = arith.mulf %8, %5 : vector<128x32xf32>
    %10 = arith.select %7, %5, %9 : vector<128x32xi1>, vector<128x32xf32>
    %11 = vector.shape_cast %10 : vector<128x32xf32> to vector<16x8x32xf32>
    %cst_6 = arith.constant dense<0.000000e+00> : vector<16x32xf32>
    %12 = vector.multi_reduction <add>, %11, %cst_6 [1] : vector<16x8x32xf32> to vector<16x32xf32>
    %13 = vector.shape_cast %12 : vector<16x32xf32> to vector<16x1x32xf32>
    %cst_7 = arith.constant 8.000000e+00 : f32
    %14 = vector.broadcast %cst_7 : f32 to vector<16x1x32xf32>
    %15 = arith.divf %13, %14 : vector<16x1x32xf32>
    %c297 = arith.constant 297 : index
    %c0_8 = arith.constant 0 : index
    %16 = vector.load %arg1[%c297, %c0_8] : memref<312x128xf32, #tpu.memory_space<vmem>>, vector<1x32xf32>
    %17 = vector.shape_cast %16 : vector<1x32xf32> to vector<1x1x32xf32>
    %18 = vector.broadcast %17 : vector<1x1x32xf32> to vector<16x1x32xf32>
    %19 = arith.mulf %18, %15 : vector<16x1x32xf32>
    %20 = vector.broadcast %19 : vector<16x1x32xf32> to vector<16x8x32xf32>
    %21 = arith.subf %11, %20 : vector<16x8x32xf32>
    %22 = arith.mulf %21, %21 : vector<16x8x32xf32>
    %cst_9 = arith.constant dense<0.000000e+00> : vector<16x32xf32>
    %23 = vector.multi_reduction <add>, %22, %cst_9 [1] : vector<16x8x32xf32> to vector<16x32xf32>
    %cst_10 = arith.constant 8.000000e+00 : f32
    %24 = vector.broadcast %cst_10 : f32 to vector<16x32xf32>
    %25 = arith.divf %23, %24 : vector<16x32xf32>
    %c298 = arith.constant 298 : index
    %c0_11 = arith.constant 0 : index
    %26 = vector.load %arg1[%c298, %c0_11] : memref<312x128xf32, #tpu.memory_space<vmem>>, vector<1x32xf32>
    %27 = vector.shape_cast %15 : vector<16x1x32xf32> to vector<16x32xf32>
    %28 = vector.broadcast %26 : vector<1x32xf32> to vector<16x32xf32>
    %29 = arith.mulf %28, %27 : vector<16x32xf32>
    %cst_12 = arith.constant 9.99999974E-6 : f32
    %30 = vector.broadcast %cst_12 : f32 to vector<16x32xf32>
    %31 = arith.addf %25, %30 : vector<16x32xf32>
    %32 = math.rsqrt %31 : vector<16x32xf32>
    %33 = arith.mulf %29, %32 : vector<16x32xf32>
    %c299 = arith.constant 299 : index
    %c0_13 = arith.constant 0 : index
    %34 = vector.load %arg1[%c299, %c0_13] : memref<312x128xf32, #tpu.memory_space<vmem>>, vector<1x32xf32>
    %35 = vector.broadcast %34 : vector<1x32xf32> to vector<16x32xf32>
    %36 = arith.addf %33, %35 : vector<16x32xf32>
    %c8 = arith.constant 8 : index
    %c0_14 = arith.constant 0 : index
    %37 = vector.load %arg1[%c8, %c0_14] : memref<312x128xf32, #tpu.memory_space<vmem>>, vector<32x64xf32>
    %cst_15 = arith.constant dense<0.000000e+00> : vector<16x64xf32>
    %38 = tpu.matmul %36, %37, %cst_15 {dimension_numbers = #tpu.dot_dimension_numbers<[1], [0], [0], [1], [0, 0, 1, 1], [], []>} : vector<16x32xf32>, vector<32x64xf32>, vector<16x64xf32> -> vector<16x64xf32>
    %c300 = arith.constant 300 : index
    %c0_16 = arith.constant 0 : index
    %39 = vector.load %arg1[%c300, %c0_16] : memref<312x128xf32, #tpu.memory_space<vmem>>, vector<1x64xf32>
    %40 = vector.broadcast %39 : vector<1x64xf32> to vector<16x64xf32>
    %41 = arith.addf %38, %40 : vector<16x64xf32>
    %c40 = arith.constant 40 : index
    %c0_17 = arith.constant 0 : index
    %42 = vector.load %arg1[%c40, %c0_17] : memref<312x128xf32, #tpu.memory_space<vmem>>, vector<32x64xf32>
    %cst_18 = arith.constant dense<0.000000e+00> : vector<16x64xf32>
    %43 = tpu.matmul %36, %42, %cst_18 {dimension_numbers = #tpu.dot_dimension_numbers<[1], [0], [0], [1], [0, 0, 1, 1], [], []>} : vector<16x32xf32>, vector<32x64xf32>, vector<16x64xf32> -> vector<16x64xf32>
    %c301 = arith.constant 301 : index
    %c0_19 = arith.constant 0 : index
    %44 = vector.load %arg1[%c301, %c0_19] : memref<312x128xf32, #tpu.memory_space<vmem>>, vector<1x64xf32>
    %45 = vector.broadcast %44 : vector<1x64xf32> to vector<16x64xf32>
    %46 = arith.addf %43, %45 : vector<16x64xf32>
    %c72 = arith.constant 72 : index
    %c0_20 = arith.constant 0 : index
    %47 = vector.load %arg1[%c72, %c0_20] : memref<312x128xf32, #tpu.memory_space<vmem>>, vector<32x64xf32>
    %cst_21 = arith.constant dense<0.000000e+00> : vector<16x64xf32>
    %48 = tpu.matmul %36, %47, %cst_21 {dimension_numbers = #tpu.dot_dimension_numbers<[1], [0], [0], [1], [0, 0, 1, 1], [], []>} : vector<16x32xf32>, vector<32x64xf32>, vector<16x64xf32> -> vector<16x64xf32>
    %c302 = arith.constant 302 : index
    %c0_22 = arith.constant 0 : index
    %49 = vector.load %arg1[%c302, %c0_22] : memref<312x128xf32, #tpu.memory_space<vmem>>, vector<1x64xf32>
    %50 = vector.broadcast %49 : vector<1x64xf32> to vector<16x64xf32>
    %51 = arith.addf %48, %50 : vector<16x64xf32>
    %cst_23 = arith.constant dense<0.000000e+00> : vector<16x16xf32>
    %52 = tpu.matmul %41, %46, %cst_23 {dimension_numbers = #tpu.dot_dimension_numbers<[1], [1], [0], [0], [0, 0, 1, 0], [], []>} : vector<16x64xf32>, vector<16x64xf32>, vector<16x16xf32> -> vector<16x16xf32>
    %53 = tpu.iota {dimensions = array<i32: 0>} : vector<16x16xi32>
    %54 = arith.sitofp %53 : vector<16x16xi32> to vector<16x16xf32>
    %55 = tpu.iota {dimensions = array<i32: 1>} : vector<16x16xi32>
    %56 = arith.sitofp %55 : vector<16x16xi32> to vector<16x16xf32>
    %cst_24 = arith.constant 1.250000e-01 : f32
    %57 = vector.broadcast %cst_24 : f32 to vector<16x16xf32>
    %58 = arith.mulf %54, %57 : vector<16x16xf32>
    %59 = math.floor %58 : vector<16x16xf32>
    %cst_25 = arith.constant 1.250000e-01 : f32
    %60 = vector.broadcast %cst_25 : f32 to vector<16x16xf32>
    %61 = arith.mulf %56, %60 : vector<16x16xf32>
    %62 = math.floor %61 : vector<16x16xf32>
    %63 = arith.cmpf oeq, %59, %62 : vector<16x16xf32>
    %cst_26 = arith.constant -1.000000e+30 : f32
    %64 = vector.broadcast %cst_26 : f32 to vector<16x16xf32>
    %65 = arith.select %63, %52, %64 : vector<16x16xi1>, vector<16x16xf32>
    %cst_27 = arith.constant dense<0xFF800000> : vector<16xf32>
    %66 = vector.multi_reduction <maximumf>, %65, %cst_27 [1] : vector<16x16xf32> to vector<16xf32>
    %67 = vector.shape_cast %66 : vector<16xf32> to vector<16x1xf32>
    %68 = vector.broadcast %67 : vector<16x1xf32> to vector<16x16xf32>
    %69 = arith.subf %65, %68 : vector<16x16xf32>
    %70 = math.exp %69 : vector<16x16xf32>
    %cst_28 = arith.constant dense<0.000000e+00> : vector<16xf32>
    %71 = vector.multi_reduction <add>, %70, %cst_28 [1] : vector<16x16xf32> to vector<16xf32>
    %72 = vector.shape_cast %71 : vector<16xf32> to vector<16x1xf32>
    %73 = vector.broadcast %72 : vector<16x1xf32> to vector<16x16xf32>
    %74 = arith.divf %70, %73 : vector<16x16xf32>
    %cst_29 = arith.constant dense<0.000000e+00> : vector<16x64xf32>
    %75 = tpu.matmul %74, %51, %cst_29 {dimension_numbers = #tpu.dot_dimension_numbers<[1], [0], [0], [1], [0, 0, 1, 1], [], []>} : vector<16x16xf32>, vector<16x64xf32>, vector<16x64xf32> -> vector<16x64xf32>
    %76 = vector.shape_cast %75 : vector<16x64xf32> to vector<2x8x64xf32>
    %cst_30 = arith.constant dense<0.000000e+00> : vector<2x64xf32>
    %77 = vector.multi_reduction <add>, %76, %cst_30 [1] : vector<2x8x64xf32> to vector<2x64xf32>
    %cst_31 = arith.constant 8.000000e+00 : f32
    %78 = vector.broadcast %cst_31 : f32 to vector<2x64xf32>
    %79 = arith.divf %77, %78 : vector<2x64xf32>
    %c104 = arith.constant 104 : index
    %c0_32 = arith.constant 0 : index
    %80 = vector.load %arg1[%c104, %c0_32] : memref<312x128xf32, #tpu.memory_space<vmem>>, vector<32x128xf32>
    %cst_33 = arith.constant dense<0.000000e+00> : vector<16x128xf32>
    %81 = tpu.matmul %36, %80, %cst_33 {dimension_numbers = #tpu.dot_dimension_numbers<[1], [0], [0], [1], [0, 0, 1, 1], [], []>} : vector<16x32xf32>, vector<32x128xf32>, vector<16x128xf32> -> vector<16x128xf32>
    %c303 = arith.constant 303 : index
    %c0_34 = arith.constant 0 : index
    %82 = vector.load %arg1[%c303, %c0_34] : memref<312x128xf32, #tpu.memory_space<vmem>>, vector<1x128xf32>
    %83 = vector.broadcast %82 : vector<1x128xf32> to vector<16x128xf32>
    %84 = arith.addf %81, %83 : vector<16x128xf32>
    %85 = vector.shape_cast %84 : vector<16x128xf32> to vector<2x8x128xf32>
    %c136 = arith.constant 136 : index
    %c0_35 = arith.constant 0 : index
    %86 = vector.load %arg1[%c136, %c0_35] : memref<312x128xf32, #tpu.memory_space<vmem>>, vector<32x128xf32>
    %cst_36 = arith.constant 0.000000e+00 : f32
    %87 = vector.broadcast %cst_36 : f32 to vector<2x32xf32>
    %cst_37 = arith.constant 0.000000e+00 : f32
    %88 = vector.broadcast %cst_37 : f32 to vector<2x32xf32>
    %89 = vector.extract_strided_slice %85 {offsets = [0, 0, 0], sizes = [2, 1, 128], strides = [1, 1, 1]} : vector<2x8x128xf32> to vector<2x1x128xf32>
    %90 = vector.shape_cast %89 : vector<2x1x128xf32> to vector<2x128xf32>
    %cst_38 = arith.constant dense<0.000000e+00> : vector<2x128xf32>
    %91 = tpu.matmul %87, %86, %cst_38 {dimension_numbers = #tpu.dot_dimension_numbers<[1], [0], [0], [1], [0, 0, 1, 1], [], []>} : vector<2x32xf32>, vector<32x128xf32>, vector<2x128xf32> -> vector<2x128xf32>
    %92 = arith.addf %90, %91 : vector<2x128xf32>
    %93 = vector.extract_strided_slice %92 {offsets = [0, 0], sizes = [2, 96], strides = [1, 1]} : vector<2x128xf32> to vector<2x96xf32>
    %94 = arith.negf %93 : vector<2x96xf32>
    %95 = math.exp %94 : vector<2x96xf32>
    %cst_39 = arith.constant 1.000000e+00 : f32
    %96 = vector.broadcast %cst_39 : f32 to vector<2x96xf32>
    %97 = arith.addf %96, %95 : vector<2x96xf32>
    %98 = arith.divf %96, %97 : vector<2x96xf32>
    %99 = vector.extract_strided_slice %98 {offsets = [0, 0], sizes = [2, 32], strides = [1, 1]} : vector<2x96xf32> to vector<2x32xf32>
    %100 = vector.extract_strided_slice %98 {offsets = [0, 32], sizes = [2, 32], strides = [1, 1]} : vector<2x96xf32> to vector<2x32xf32>
    %101 = vector.extract_strided_slice %98 {offsets = [0, 64], sizes = [2, 32], strides = [1, 1]} : vector<2x96xf32> to vector<2x32xf32>
    %102 = vector.extract_strided_slice %92 {offsets = [0, 96], sizes = [2, 32], strides = [1, 1]} : vector<2x128xf32> to vector<2x32xf32>
    %103 = math.tanh %102 : vector<2x32xf32>
    %104 = arith.mulf %100, %88 : vector<2x32xf32>
    %105 = arith.mulf %99, %103 : vector<2x32xf32>
    %106 = arith.addf %104, %105 : vector<2x32xf32>
    %107 = math.tanh %106 : vector<2x32xf32>
    %108 = arith.mulf %101, %107 : vector<2x32xf32>
    %109 = vector.extract_strided_slice %85 {offsets = [0, 1, 0], sizes = [2, 1, 128], strides = [1, 1, 1]} : vector<2x8x128xf32> to vector<2x1x128xf32>
    %110 = vector.shape_cast %109 : vector<2x1x128xf32> to vector<2x128xf32>
    %cst_40 = arith.constant dense<0.000000e+00> : vector<2x128xf32>
    %111 = tpu.matmul %108, %86, %cst_40 {dimension_numbers = #tpu.dot_dimension_numbers<[1], [0], [0], [1], [0, 0, 1, 1], [], []>} : vector<2x32xf32>, vector<32x128xf32>, vector<2x128xf32> -> vector<2x128xf32>
    %112 = arith.addf %110, %111 : vector<2x128xf32>
    %113 = vector.extract_strided_slice %112 {offsets = [0, 0], sizes = [2, 96], strides = [1, 1]} : vector<2x128xf32> to vector<2x96xf32>
    %114 = arith.negf %113 : vector<2x96xf32>
    %115 = math.exp %114 : vector<2x96xf32>
    %cst_41 = arith.constant 1.000000e+00 : f32
    %116 = vector.broadcast %cst_41 : f32 to vector<2x96xf32>
    %117 = arith.addf %116, %115 : vector<2x96xf32>
    %118 = arith.divf %116, %117 : vector<2x96xf32>
    %119 = vector.extract_strided_slice %118 {offsets = [0, 0], sizes = [2, 32], strides = [1, 1]} : vector<2x96xf32> to vector<2x32xf32>
    %120 = vector.extract_strided_slice %118 {offsets = [0, 32], sizes = [2, 32], strides = [1, 1]} : vector<2x96xf32> to vector<2x32xf32>
    %121 = vector.extract_strided_slice %118 {offsets = [0, 64], sizes = [2, 32], strides = [1, 1]} : vector<2x96xf32> to vector<2x32xf32>
    %122 = vector.extract_strided_slice %112 {offsets = [0, 96], sizes = [2, 32], strides = [1, 1]} : vector<2x128xf32> to vector<2x32xf32>
    %123 = math.tanh %122 : vector<2x32xf32>
    %124 = arith.mulf %120, %106 : vector<2x32xf32>
    %125 = arith.mulf %119, %123 : vector<2x32xf32>
    %126 = arith.addf %124, %125 : vector<2x32xf32>
    %127 = math.tanh %126 : vector<2x32xf32>
    %128 = arith.mulf %121, %127 : vector<2x32xf32>
    %129 = vector.extract_strided_slice %85 {offsets = [0, 2, 0], sizes = [2, 1, 128], strides = [1, 1, 1]} : vector<2x8x128xf32> to vector<2x1x128xf32>
    %130 = vector.shape_cast %129 : vector<2x1x128xf32> to vector<2x128xf32>
    %cst_42 = arith.constant dense<0.000000e+00> : vector<2x128xf32>
    %131 = tpu.matmul %128, %86, %cst_42 {dimension_numbers = #tpu.dot_dimension_numbers<[1], [0], [0], [1], [0, 0, 1, 1], [], []>} : vector<2x32xf32>, vector<32x128xf32>, vector<2x128xf32> -> vector<2x128xf32>
    %132 = arith.addf %130, %131 : vector<2x128xf32>
    %133 = vector.extract_strided_slice %132 {offsets = [0, 0], sizes = [2, 96], strides = [1, 1]} : vector<2x128xf32> to vector<2x96xf32>
    %134 = arith.negf %133 : vector<2x96xf32>
    %135 = math.exp %134 : vector<2x96xf32>
    %cst_43 = arith.constant 1.000000e+00 : f32
    %136 = vector.broadcast %cst_43 : f32 to vector<2x96xf32>
    %137 = arith.addf %136, %135 : vector<2x96xf32>
    %138 = arith.divf %136, %137 : vector<2x96xf32>
    %139 = vector.extract_strided_slice %138 {offsets = [0, 0], sizes = [2, 32], strides = [1, 1]} : vector<2x96xf32> to vector<2x32xf32>
    %140 = vector.extract_strided_slice %138 {offsets = [0, 32], sizes = [2, 32], strides = [1, 1]} : vector<2x96xf32> to vector<2x32xf32>
    %141 = vector.extract_strided_slice %138 {offsets = [0, 64], sizes = [2, 32], strides = [1, 1]} : vector<2x96xf32> to vector<2x32xf32>
    %142 = vector.extract_strided_slice %132 {offsets = [0, 96], sizes = [2, 32], strides = [1, 1]} : vector<2x128xf32> to vector<2x32xf32>
    %143 = math.tanh %142 : vector<2x32xf32>
    %144 = arith.mulf %140, %126 : vector<2x32xf32>
    %145 = arith.mulf %139, %143 : vector<2x32xf32>
    %146 = arith.addf %144, %145 : vector<2x32xf32>
    %147 = math.tanh %146 : vector<2x32xf32>
    %148 = arith.mulf %141, %147 : vector<2x32xf32>
    %149 = vector.extract_strided_slice %85 {offsets = [0, 3, 0], sizes = [2, 1, 128], strides = [1, 1, 1]} : vector<2x8x128xf32> to vector<2x1x128xf32>
    %150 = vector.shape_cast %149 : vector<2x1x128xf32> to vector<2x128xf32>
    %cst_44 = arith.constant dense<0.000000e+00> : vector<2x128xf32>
    %151 = tpu.matmul %148, %86, %cst_44 {dimension_numbers = #tpu.dot_dimension_numbers<[1], [0], [0], [1], [0, 0, 1, 1], [], []>} : vector<2x32xf32>, vector<32x128xf32>, vector<2x128xf32> -> vector<2x128xf32>
    %152 = arith.addf %150, %151 : vector<2x128xf32>
    %153 = vector.extract_strided_slice %152 {offsets = [0, 0], sizes = [2, 96], strides = [1, 1]} : vector<2x128xf32> to vector<2x96xf32>
    %154 = arith.negf %153 : vector<2x96xf32>
    %155 = math.exp %154 : vector<2x96xf32>
    %cst_45 = arith.constant 1.000000e+00 : f32
    %156 = vector.broadcast %cst_45 : f32 to vector<2x96xf32>
    %157 = arith.addf %156, %155 : vector<2x96xf32>
    %158 = arith.divf %156, %157 : vector<2x96xf32>
    %159 = vector.extract_strided_slice %158 {offsets = [0, 0], sizes = [2, 32], strides = [1, 1]} : vector<2x96xf32> to vector<2x32xf32>
    %160 = vector.extract_strided_slice %158 {offsets = [0, 32], sizes = [2, 32], strides = [1, 1]} : vector<2x96xf32> to vector<2x32xf32>
    %161 = vector.extract_strided_slice %158 {offsets = [0, 64], sizes = [2, 32], strides = [1, 1]} : vector<2x96xf32> to vector<2x32xf32>
    %162 = vector.extract_strided_slice %152 {offsets = [0, 96], sizes = [2, 32], strides = [1, 1]} : vector<2x128xf32> to vector<2x32xf32>
    %163 = math.tanh %162 : vector<2x32xf32>
    %164 = arith.mulf %160, %146 : vector<2x32xf32>
    %165 = arith.mulf %159, %163 : vector<2x32xf32>
    %166 = arith.addf %164, %165 : vector<2x32xf32>
    %167 = math.tanh %166 : vector<2x32xf32>
    %168 = arith.mulf %161, %167 : vector<2x32xf32>
    %169 = vector.extract_strided_slice %85 {offsets = [0, 4, 0], sizes = [2, 1, 128], strides = [1, 1, 1]} : vector<2x8x128xf32> to vector<2x1x128xf32>
    %170 = vector.shape_cast %169 : vector<2x1x128xf32> to vector<2x128xf32>
    %cst_46 = arith.constant dense<0.000000e+00> : vector<2x128xf32>
    %171 = tpu.matmul %168, %86, %cst_46 {dimension_numbers = #tpu.dot_dimension_numbers<[1], [0], [0], [1], [0, 0, 1, 1], [], []>} : vector<2x32xf32>, vector<32x128xf32>, vector<2x128xf32> -> vector<2x128xf32>
    %172 = arith.addf %170, %171 : vector<2x128xf32>
    %173 = vector.extract_strided_slice %172 {offsets = [0, 0], sizes = [2, 96], strides = [1, 1]} : vector<2x128xf32> to vector<2x96xf32>
    %174 = arith.negf %173 : vector<2x96xf32>
    %175 = math.exp %174 : vector<2x96xf32>
    %cst_47 = arith.constant 1.000000e+00 : f32
    %176 = vector.broadcast %cst_47 : f32 to vector<2x96xf32>
    %177 = arith.addf %176, %175 : vector<2x96xf32>
    %178 = arith.divf %176, %177 : vector<2x96xf32>
    %179 = vector.extract_strided_slice %178 {offsets = [0, 0], sizes = [2, 32], strides = [1, 1]} : vector<2x96xf32> to vector<2x32xf32>
    %180 = vector.extract_strided_slice %178 {offsets = [0, 32], sizes = [2, 32], strides = [1, 1]} : vector<2x96xf32> to vector<2x32xf32>
    %181 = vector.extract_strided_slice %178 {offsets = [0, 64], sizes = [2, 32], strides = [1, 1]} : vector<2x96xf32> to vector<2x32xf32>
    %182 = vector.extract_strided_slice %172 {offsets = [0, 96], sizes = [2, 32], strides = [1, 1]} : vector<2x128xf32> to vector<2x32xf32>
    %183 = math.tanh %182 : vector<2x32xf32>
    %184 = arith.mulf %180, %166 : vector<2x32xf32>
    %185 = arith.mulf %179, %183 : vector<2x32xf32>
    %186 = arith.addf %184, %185 : vector<2x32xf32>
    %187 = math.tanh %186 : vector<2x32xf32>
    %188 = arith.mulf %181, %187 : vector<2x32xf32>
    %189 = vector.extract_strided_slice %85 {offsets = [0, 5, 0], sizes = [2, 1, 128], strides = [1, 1, 1]} : vector<2x8x128xf32> to vector<2x1x128xf32>
    %190 = vector.shape_cast %189 : vector<2x1x128xf32> to vector<2x128xf32>
    %cst_48 = arith.constant dense<0.000000e+00> : vector<2x128xf32>
    %191 = tpu.matmul %188, %86, %cst_48 {dimension_numbers = #tpu.dot_dimension_numbers<[1], [0], [0], [1], [0, 0, 1, 1], [], []>} : vector<2x32xf32>, vector<32x128xf32>, vector<2x128xf32> -> vector<2x128xf32>
    %192 = arith.addf %190, %191 : vector<2x128xf32>
    %193 = vector.extract_strided_slice %192 {offsets = [0, 0], sizes = [2, 96], strides = [1, 1]} : vector<2x128xf32> to vector<2x96xf32>
    %194 = arith.negf %193 : vector<2x96xf32>
    %195 = math.exp %194 : vector<2x96xf32>
    %cst_49 = arith.constant 1.000000e+00 : f32
    %196 = vector.broadcast %cst_49 : f32 to vector<2x96xf32>
    %197 = arith.addf %196, %195 : vector<2x96xf32>
    %198 = arith.divf %196, %197 : vector<2x96xf32>
    %199 = vector.extract_strided_slice %198 {offsets = [0, 0], sizes = [2, 32], strides = [1, 1]} : vector<2x96xf32> to vector<2x32xf32>
    %200 = vector.extract_strided_slice %198 {offsets = [0, 32], sizes = [2, 32], strides = [1, 1]} : vector<2x96xf32> to vector<2x32xf32>
    %201 = vector.extract_strided_slice %198 {offsets = [0, 64], sizes = [2, 32], strides = [1, 1]} : vector<2x96xf32> to vector<2x32xf32>
    %202 = vector.extract_strided_slice %192 {offsets = [0, 96], sizes = [2, 32], strides = [1, 1]} : vector<2x128xf32> to vector<2x32xf32>
    %203 = math.tanh %202 : vector<2x32xf32>
    %204 = arith.mulf %200, %186 : vector<2x32xf32>
    %205 = arith.mulf %199, %203 : vector<2x32xf32>
    %206 = arith.addf %204, %205 : vector<2x32xf32>
    %207 = math.tanh %206 : vector<2x32xf32>
    %208 = arith.mulf %201, %207 : vector<2x32xf32>
    %209 = vector.extract_strided_slice %85 {offsets = [0, 6, 0], sizes = [2, 1, 128], strides = [1, 1, 1]} : vector<2x8x128xf32> to vector<2x1x128xf32>
    %210 = vector.shape_cast %209 : vector<2x1x128xf32> to vector<2x128xf32>
    %cst_50 = arith.constant dense<0.000000e+00> : vector<2x128xf32>
    %211 = tpu.matmul %208, %86, %cst_50 {dimension_numbers = #tpu.dot_dimension_numbers<[1], [0], [0], [1], [0, 0, 1, 1], [], []>} : vector<2x32xf32>, vector<32x128xf32>, vector<2x128xf32> -> vector<2x128xf32>
    %212 = arith.addf %210, %211 : vector<2x128xf32>
    %213 = vector.extract_strided_slice %212 {offsets = [0, 0], sizes = [2, 96], strides = [1, 1]} : vector<2x128xf32> to vector<2x96xf32>
    %214 = arith.negf %213 : vector<2x96xf32>
    %215 = math.exp %214 : vector<2x96xf32>
    %cst_51 = arith.constant 1.000000e+00 : f32
    %216 = vector.broadcast %cst_51 : f32 to vector<2x96xf32>
    %217 = arith.addf %216, %215 : vector<2x96xf32>
    %218 = arith.divf %216, %217 : vector<2x96xf32>
    %219 = vector.extract_strided_slice %218 {offsets = [0, 0], sizes = [2, 32], strides = [1, 1]} : vector<2x96xf32> to vector<2x32xf32>
    %220 = vector.extract_strided_slice %218 {offsets = [0, 32], sizes = [2, 32], strides = [1, 1]} : vector<2x96xf32> to vector<2x32xf32>
    %221 = vector.extract_strided_slice %218 {offsets = [0, 64], sizes = [2, 32], strides = [1, 1]} : vector<2x96xf32> to vector<2x32xf32>
    %222 = vector.extract_strided_slice %212 {offsets = [0, 96], sizes = [2, 32], strides = [1, 1]} : vector<2x128xf32> to vector<2x32xf32>
    %223 = math.tanh %222 : vector<2x32xf32>
    %224 = arith.mulf %220, %206 : vector<2x32xf32>
    %225 = arith.mulf %219, %223 : vector<2x32xf32>
    %226 = arith.addf %224, %225 : vector<2x32xf32>
    %227 = math.tanh %226 : vector<2x32xf32>
    %228 = arith.mulf %221, %227 : vector<2x32xf32>
    %229 = vector.extract_strided_slice %85 {offsets = [0, 7, 0], sizes = [2, 1, 128], strides = [1, 1, 1]} : vector<2x8x128xf32> to vector<2x1x128xf32>
    %230 = vector.shape_cast %229 : vector<2x1x128xf32> to vector<2x128xf32>
    %cst_52 = arith.constant dense<0.000000e+00> : vector<2x128xf32>
    %231 = tpu.matmul %228, %86, %cst_52 {dimension_numbers = #tpu.dot_dimension_numbers<[1], [0], [0], [1], [0, 0, 1, 1], [], []>} : vector<2x32xf32>, vector<32x128xf32>, vector<2x128xf32> -> vector<2x128xf32>
    %232 = arith.addf %230, %231 : vector<2x128xf32>
    %233 = vector.extract_strided_slice %232 {offsets = [0, 0], sizes = [2, 96], strides = [1, 1]} : vector<2x128xf32> to vector<2x96xf32>
    %234 = arith.negf %233 : vector<2x96xf32>
    %235 = math.exp %234 : vector<2x96xf32>
    %cst_53 = arith.constant 1.000000e+00 : f32
    %236 = vector.broadcast %cst_53 : f32 to vector<2x96xf32>
    %237 = arith.addf %236, %235 : vector<2x96xf32>
    %238 = arith.divf %236, %237 : vector<2x96xf32>
    %239 = vector.extract_strided_slice %238 {offsets = [0, 0], sizes = [2, 32], strides = [1, 1]} : vector<2x96xf32> to vector<2x32xf32>
    %240 = vector.extract_strided_slice %238 {offsets = [0, 32], sizes = [2, 32], strides = [1, 1]} : vector<2x96xf32> to vector<2x32xf32>
    %241 = vector.extract_strided_slice %238 {offsets = [0, 64], sizes = [2, 32], strides = [1, 1]} : vector<2x96xf32> to vector<2x32xf32>
    %242 = vector.extract_strided_slice %232 {offsets = [0, 96], sizes = [2, 32], strides = [1, 1]} : vector<2x128xf32> to vector<2x32xf32>
    %243 = math.tanh %242 : vector<2x32xf32>
    %244 = arith.mulf %240, %226 : vector<2x32xf32>
    %245 = arith.mulf %239, %243 : vector<2x32xf32>
    %246 = arith.addf %244, %245 : vector<2x32xf32>
    %247 = math.tanh %246 : vector<2x32xf32>
    %248 = arith.mulf %241, %247 : vector<2x32xf32>
    %c168 = arith.constant 168 : index
    %c0_54 = arith.constant 0 : index
    %249 = vector.load %arg1[%c168, %c0_54] : memref<312x128xf32, #tpu.memory_space<vmem>>, vector<64x32xf32>
    %cst_55 = arith.constant dense<0.000000e+00> : vector<2x32xf32>
    %250 = tpu.matmul %79, %249, %cst_55 {dimension_numbers = #tpu.dot_dimension_numbers<[1], [0], [0], [1], [0, 0, 1, 1], [], []>} : vector<2x64xf32>, vector<64x32xf32>, vector<2x32xf32> -> vector<2x32xf32>
    %c232 = arith.constant 232 : index
    %c0_56 = arith.constant 0 : index
    %251 = vector.load %arg1[%c232, %c0_56] : memref<312x128xf32, #tpu.memory_space<vmem>>, vector<32x32xf32>
    %cst_57 = arith.constant dense<0.000000e+00> : vector<2x32xf32>
    %252 = tpu.matmul %248, %251, %cst_57 {dimension_numbers = #tpu.dot_dimension_numbers<[1], [0], [0], [1], [0, 0, 1, 1], [], []>} : vector<2x32xf32>, vector<32x32xf32>, vector<2x32xf32> -> vector<2x32xf32>
    %253 = arith.addf %250, %252 : vector<2x32xf32>
    %c304 = arith.constant 304 : index
    %c0_58 = arith.constant 0 : index
    %254 = vector.load %arg1[%c304, %c0_58] : memref<312x128xf32, #tpu.memory_space<vmem>>, vector<1x32xf32>
    %255 = vector.broadcast %254 : vector<1x32xf32> to vector<2x32xf32>
    %256 = arith.addf %253, %255 : vector<2x32xf32>
    %cst_59 = arith.constant 0.000000e+00 : f32
    %257 = vector.broadcast %cst_59 : f32 to vector<2x32xf32>
    %258 = arith.maximumf %256, %257 : vector<2x32xf32>
    %c264 = arith.constant 264 : index
    %c0_60 = arith.constant 0 : index
    %259 = vector.load %arg1[%c264, %c0_60] : memref<312x128xf32, #tpu.memory_space<vmem>>, vector<32x4xf32>
    %cst_61 = arith.constant dense<0.000000e+00> : vector<2x4xf32>
    %260 = tpu.matmul %258, %259, %cst_61 {dimension_numbers = #tpu.dot_dimension_numbers<[1], [0], [0], [1], [0, 0, 1, 1], [], []>} : vector<2x32xf32>, vector<32x4xf32>, vector<2x4xf32> -> vector<2x4xf32>
    %c305 = arith.constant 305 : index
    %c0_62 = arith.constant 0 : index
    %261 = vector.load %arg1[%c305, %c0_62] : memref<312x128xf32, #tpu.memory_space<vmem>>, vector<1x4xf32>
    %262 = vector.broadcast %261 : vector<1x4xf32> to vector<2x4xf32>
    %263 = arith.addf %260, %262 : vector<2x4xf32>
    %cst_63 = arith.constant 0.000000e+00 : f32
    %264 = vector.broadcast %cst_63 : f32 to vector<14x4xf32>
    %265 = tpu.concatenate %263, %264 in 0 : vector<2x4xf32>, vector<14x4xf32> -> vector<16x4xf32>
    %cst_64 = arith.constant 0.000000e+00 : f32
    %266 = vector.broadcast %cst_64 : f32 to vector<16x108xf32>
    %267 = tpu.concatenate %74, %265, %266 in 1 : vector<16x16xf32>, vector<16x4xf32>, vector<16x108xf32> -> vector<16x128xf32>
    %c0_65 = arith.constant 0 : index
    %c0_66 = arith.constant 0 : index
    %268 = vector.load %arg2[%c0_65, %c0_66] : memref<16x128xf32, #tpu.memory_space<vmem>>, vector<16x128xf32>
    tpu.vector_store %arg2[%c0_65, %c0_66], %267 {strides = array<i32>} : memref<16x128xf32, #tpu.memory_space<vmem>>, vector<16x128xf32>,
    return
  }
}

</mosaic_0001>

<bundles_post_ra>
// kernel: spatio_temporal_forward.1
= control target key start
LH: loop header
LB: loop body
LE: loop exit
PB: predicated region body
PF: predicated region fallthrough
CT: control target
= control target key end

     0   :  { %7 = vsyncpa [#allocation3], 0  ;;  %s3432_s9 = smov [#allocation2]   ;;  %s4034_s0 = inlined_call_operand.vmem [shape: f32[128,8], index: 0, kind: input, shape index: {}]   ;;  %s4035_s1 = inlined_call_operand.hbm [shape: f32[312,128], index: 1, kind: input, shape index: {}]   ;;  %s4036_s2 = inlined_call_operand.vmem [shape: f32[16,128], index: 2, kind: output, shape index: {}]  }
   0x1   :  { %s15_s10 = sshll.u32 %s3432_s9, 4  ;;  %s3408_s13 = scalar_lea.hbm %s4035_s1, 4992  ;;  %s16_s10 = int_to_ptr.vmem [resolvable:$true] %s15_s10 }
   0x2   :  { %p3409_p0 = scmp.ne.s32.totalorder %s4035_s1, %s3408_s13  ;;  %p3412_p1 = scmp.lt.u32.totalorder %s3408_s13, %s4035_s1 }
   0x4   :  { %p3414_p2 = pnand %p3412_p1, %p3409_p0 }
   0x6   :  { %3417 = shalt.err (!%p3414_p2)
}
   0x7   :  { %s3418_s18 = scalar_lea.vmem %s16_s10, 4992  ;;  %p3423_p4 = scmp.lt.s32.totalorder %s16_s10, %s16_s10 }
   0x8   :  { %p3419_p3 = scmp.ne.s32.totalorder %s16_s10, %s3418_s18  ;;  %p3424_p5 = scmp.lt.s32.totalorder %s3418_s18, %s3418_s18 }
   0xa   :  { %p3425_p6 = por %p3424_p5, %p3423_p4 }
   0xc   :  { %p3426_p7 = pnand %p3425_p6, %p3419_p3 }
   0xe   :  { %3429 = shalt.err (!%p3426_p7)
}
   0xf   :  { %s3433_s19 = smov 128   ;;  %s3434_s20 = smov 8  }
  0x10   :  { %21 = dma.hbm_to_vmem [thread:$0]  %s4035_s1, 4992, %s16_s10, [#allocation3], %s3433_s19, %s3433_s19, %s3434_s20  }
  0x11   :  { %3430 = dma.done.wait [#allocation3], 4992  }
  0x12   :  { %3431 = vsyncadd [#allocation3], 4294962304  ;;  %vm47_vm0 = vcmask 64512   ;;  %v41_v0 = vld [vmem:[#allocation2] sm:$0xff]  ;;  %v26_v2 = vld [vmem:[%s4034_s0 + $0x8] sm:$0xff]  ;;  %v436_v20 = vlaneseq  ;;  %vm289_vm2 = vcmask 261120  }
  0x13   :  { %v25_v1 = vld [vmem:[%s4034_s0] sm:$0xff]  ;;  %2904 = vmatprep.subr.mxu0 %v41_v0  ;;  %v27_v3 = vld [vmem:[%s4034_s0 + $0x10] sm:$0xff]  ;;  %v28_v4 = vld [vmem:[%s4034_s0 + $0x18] sm:$0xff]  ;;  %vm681_vm6 = vcmask 1041409   ;;  %vm683_vm9 = vcmask 1042434   ;;  %vm685_vm10 = vcmask 1043459  }
  0x14   :  { %2906 = vmatprep.mubr.msk.f32.mxu0 %vm47_vm0, %v25_v1  ;;  %2905 = vmatpush3.msra.mxu0 %v41_v0  ;;  %v29_v5 = vld [vmem:[%s4034_s0 + $0x20] sm:$0xff]  ;;  %v30_v6 = vld [vmem:[%s4034_s0 + $0x28] sm:$0xff]  ;;  %v31_v7 = vld [vmem:[%s4034_s0 + $0x30] sm:$0xff]  ;;  %v3539_v27 = vshrl.u32 %v436_v20, 7  ;;  %vm687_vm13 = vcmask 1044484   ;;  %s3439_s26 = smov 64  }
  0x15   :  { %2907 = vmatmul.mubr.msk.f32.vlgmr.msra.gmra.mrb[0].mxu0 %vm47_vm0, %v26_v2  ;;  %v32_v8 = vld [vmem:[%s4034_s0 + $0x38] sm:$0xff]  ;;  %v33_v9 = vld [vmem:[%s4034_s0 + $0x40] sm:$0xff]  ;;  %v34_v10 = vld [vmem:[%s4034_s0 + $0x48] sm:$0xff]  ;;  %s3440_s27 = smov 16  }
  0x16   :  { %2909 = vmatprep.mubr.msk.f32.mxu0 %vm47_vm0, %v27_v3  ;;  %v35_v11 = vld [vmem:[%s4034_s0 + $0x50] sm:$0xff]  ;;  %v36_v12 = vld [vmem:[%s4034_s0 + $0x58] sm:$0xff]  ;;  %v37_v13 = vld [vmem:[%s4034_s0 + $0x60] sm:$0xff]  ;;  %v3550_v40 = vsub.s32 0, %v3539_v27 }
  0x17   :  { %v38_v14 = vld [vmem:[%s4034_s0 + $0x68] sm:$0xff]  ;;  %v39_v15 = vld [vmem:[%s4034_s0 + $0x70] sm:$0xff]  ;;  %v40_v16 = vld [vmem:[%s4034_s0 + $0x78] sm:$0xff]  ;;  %s3438_s0 = smov 32  }
  0x18   :  { %v3532_v17 = vld [vmem:[#allocation2 + $0x128] ss:$0 sm:$0xff] }
  0x19   :  { %2910 = vmatmul.mubr.msk.f32.gmra.mrb[2].mxu0 %vm47_vm0, %v28_v4 }
  0x1a   :  { %2912 = vmatprep.mubr.msk.f32.mxu0 %vm47_vm0, %v29_v5 }
  0x1d   :  { %2913 = vmatmul.mubr.msk.f32.gmra.mrb[4].mxu0 %vm47_vm0, %v30_v6 }
  0x1e   :  { %2915 = vmatprep.mubr.msk.f32.mxu0 %vm47_vm0, %v31_v7 }
  0x21   :  { %2916 = vmatmul.mubr.msk.f32.gmra.mrb[6].mxu0 %vm47_vm0, %v32_v8 }
  0x22   :  { %2918 = vmatprep.mubr.msk.f32.mxu0 %vm47_vm0, %v33_v9 }
  0x25   :  { %2919 = vmatmul.mubr.msk.f32.gmra.mrb[8].mxu0 %vm47_vm0, %v34_v10 }
  0x26   :  { %2921 = vmatprep.mubr.msk.f32.mxu0 %vm47_vm0, %v35_v11 }
  0x29   :  { %2922 = vmatmul.mubr.msk.f32.gmra.mrb[10].mxu0 %vm47_vm0, %v36_v12 }
  0x2a   :  { %2924 = vmatprep.mubr.msk.f32.mxu0 %vm47_vm0, %v37_v13  ;;  %v3578_v13 = vld [vmem:[#allocation2 + $0x129] sm:$0x1] }
  0x2d   :  { %2925 = vmatmul.mubr.msk.f32.gmra.mrb[12].mxu0 %vm47_vm0, %v38_v14 }
  0x2e   :  { %2927 = vmatprep.mubr.msk.f32.mxu0 %vm47_vm0, %v39_v15 }
  0x31   :  { %2928 = vmatmul.mubr.msk.f32.gmra.mrb[14].mxu0 %vm47_vm0, %v40_v16 }
  0xe8   :  { %v2908_v18 = vpop.f32.mrb[0].mxu0 }
  0xe9   :  { %v168_v19 = vadd.f32 %v2908_v18, %v3532_v17  ;;  %v162_v21 = vpop.f32.mrb[1].mxu0 }
  0xea   :  { %v163_v22 = vadd.f32 %v3532_v17, %v162_v21 }
  0xeb   :  { %vm242_vm1 = vcmp.gt.f32.partialorder %v168_v19, 0.0  ;;  %v258_v23 = vmul.f32 0.1, %v168_v19 }
  0xec   :  { %vm241_vm3 = vcmp.gt.f32.partialorder %v163_v22, 0.0  ;;  %v257_v24 = vmul.f32 0.1, %v163_v22  ;;  %v2911_v25 = vpop.f32.mrb[2].mxu0 }
  0xed   :  { %v3536_v26 = vsel %vm242_vm1, %v168_v19, %v258_v23  ;;  %v178_v28 = vadd.f32 %v2911_v25, %v3532_v17  ;;  %v172_v29 = vpop.f32.mrb[3].mxu0 }
  0xee   :  { %v297_v30 = vsel %vm289_vm2, %v3536_v26, 0.0  ;;  %v3544_v31 = vsel %vm241_vm3, %v163_v22, %v257_v24  ;;  %v173_v32 = vadd.f32 %v3532_v17, %v172_v29 }
  0xef   :  { %v298_v33 = vrot.slane %v297_v30, 4  ;;  %v290_v34 = vsel %vm289_vm2, %v3544_v31, 0.0  ;;  %vm244_vm4 = vcmp.gt.f32.partialorder %v178_v28, 0.0  ;;  %v260_v35 = vmul.f32 0.1, %v178_v28 }
  0xf0   :  { %v291_v36 = vrot.slane %v290_v34, 4  ;;  %vm243_vm5 = vcmp.gt.f32.partialorder %v173_v32, 0.0  ;;  %v259_v37 = vmul.f32 0.1, %v173_v32  ;;  %v2914_v38 = vpop.f32.mrb[4].mxu0 }
  0xf1   :  { %v299_v39 = vadd.f32 %v298_v33, %v297_v30  ;;  %v3552_v41 = vsel %vm244_vm4, %v178_v28, %v260_v35  ;;  %v188_v42 = vadd.f32 %v2914_v38, %v3532_v17  ;;  %v182_v43 = vpop.f32.mrb[5].mxu0 }
  0xf2   :  { %v292_v44 = vadd.f32 %v291_v36, %v290_v34  ;;  %v311_v45 = vsel %vm289_vm2, %v3552_v41, 0.0  ;;  %v3557_v46 = vsel %vm243_vm5, %v173_v32, %v259_v37  ;;  %v183_v47 = vadd.f32 %v3532_v17, %v182_v43 }
  0xf3   :  { %v300_v48 = vrot.slane %v299_v39, 2  ;;  %v312_v49 = vrot.slane %v311_v45, 4  ;;  %v304_v50 = vsel %vm289_vm2, %v3557_v46, 0.0  ;;  %vm246_vm7 = vcmp.gt.f32.partialorder %v188_v42, 0.0 }
  0xf4   :  { %v293_v51 = vrot.slane %v292_v44, 2  ;;  %v305_v52 = vrot.slane %v304_v50, 4  ;;  %v262_v53 = vmul.f32 0.1, %v188_v42  ;;  %vm245_vm8 = vcmp.gt.f32.partialorder %v183_v47, 0.0  ;;  %v2917_v54 = vpop.f32.mrb[6].mxu0 }
  0xf5   :  { %v301_v55 = vadd.f32 %v300_v48, %v299_v39  ;;  %v313_v56 = vadd.f32 %v312_v49, %v311_v45  ;;  %v261_v57 = vmul.f32 0.1, %v183_v47  ;;  %v198_v58 = vadd.f32 %v2917_v54, %v3532_v17  ;;  %v192_v59 = vpop.f32.mrb[7].mxu0 }
  0xf6   :  { %v294_v60 = vadd.f32 %v293_v51, %v292_v44  ;;  %v306_v61 = vadd.f32 %v305_v52, %v304_v50  ;;  %v3563_v62 = vsel %vm246_vm7, %v188_v42, %v262_v53  ;;  %v3566_v63 = vadd.f32 %v3532_v17, %v192_v59 }
  0xf7   :  { %v302_v0 = vrot.slane %v301_v55, 1  ;;  %v314_v1 = vrot.slane %v313_v56, 2  ;;  %v325_v2 = vsel %vm289_vm2, %v3563_v62, 0.0  ;;  %v3570_v3 = vsel %vm245_vm8, %v183_v47, %v261_v57 }
  0xf8   :  { %v295_v4 = vrot.slane %v294_v60, 1  ;;  %v307_v5 = vrot.slane %v306_v61, 2  ;;  %v326_v6 = vrot.slane %v325_v2, 4  ;;  %v318_v7 = vsel %vm289_vm2, %v3570_v3, 0.0  ;;  %v3574_v8 = vpop.f32.mrb[8].mxu0 }
  0xf9   :  { %v303_v9 = vadd.f32 %v302_v0, %v301_v55  ;;  %v315_v10 = vadd.f32 %v314_v1, %v313_v56  ;;  %v319_v11 = vrot.slane %v318_v7, 4  ;;  %vm248_vm11 = vcmp.gt.f32.partialorder %v198_v58, 0.0  ;;  %v3576_v12 = vpop.f32.mrb[9].mxu0 }
  0xfa   :  { %v296_v14 = vadd.f32 %v295_v4, %v294_v60  ;;  %v308_v15 = vadd.f32 %v307_v5, %v306_v61  ;;  %v327_v16 = vadd.f32 %v326_v6, %v325_v2  ;;  %v264_v18 = vmul.f32 0.1, %v198_v58 }
  0xfb   :  { %v404_v19 = vmul.f32 0.125, %v303_v9  ;;  %v316_v21 = vrot.slane %v315_v10, 1  ;;  %v320_v22 = vadd.f32 %v319_v11, %v318_v7  ;;  %vm247_vm12 = vcmp.gt.f32.partialorder %v3566_v63, 0.0 }
  0xfc   :  { %v403_v23 = vmul.f32 0.125, %v296_v14  ;;  %v309_v24 = vrot.slane %v308_v15, 1  ;;  %v328_v25 = vrot.slane %v327_v16, 2  ;;  %v3581_v28 = vsel %vm248_vm11, %v198_v58, %v264_v18  ;;  %v3583_v29 = vpop.f32.mrb[10].mxu0 }
  0xfd   :  { %v421_v30 = vmul.f32 %v3578_v13, %v404_v19  ;;  %v317_v32 = vadd.f32 %v316_v21, %v315_v10  ;;  %v321_v33 = vrot.slane %v320_v22, 2  ;;  %v339_v34 = vsel %vm289_vm2, %v3581_v28, 0.0  ;;  %v3588_v35 = vpop.f32.mrb[11].mxu0 }
  0xfe   :  { %v420_v36 = vmul.f32 %v3578_v13, %v403_v23  ;;  %v682_v37 = vsel %vm681_vm6, %v404_v19, %v403_v23  ;;  %v310_v38 = vadd.f32 %v309_v24, %v308_v15  ;;  %v329_v39 = vadd.f32 %v328_v25, %v327_v16 }
  0xff   :  { %v443_v42 = vrot.slane %v421_v30, %v3550_v40  ;;  %v406_v43 = vmul.f32 0.125, %v317_v32  ;;  %v322_v44 = vadd.f32 %v321_v33, %v320_v22  ;;  %v340_v45 = vrot.slane %v339_v34, 4 }
 0x100   :  { %v439_v47 = vrot.slane %v420_v36, %v3550_v40  ;;  %v405_v48 = vmul.f32 0.125, %v310_v38  ;;  %v330_v49 = vrot.slane %v329_v39, 1  ;;  %v263_v50 = vmul.f32 0.1, %v3566_v63  ;;  %v3595_v51 = vpop.f32.mrb[12].mxu0 }
 0x101   :  { %v501_v52 = vsub.f32 %v3536_v26, %v443_v42  ;;  %v423_v53 = vmul.f32 %v3578_v13, %v406_v43  ;;  %v323_v54 = vrot.slane %v322_v44, 1  ;;  %v341_v55 = vadd.f32 %v340_v45, %v339_v34  ;;  %v3599_v56 = vpop.f32.mrb[13].mxu0 }
 0x102   :  { %v500_v57 = vsub.f32 %v3544_v31, %v439_v47  ;;  %v422_v58 = vmul.f32 %v3578_v13, %v405_v48  ;;  %v684_v59 = vsel %vm683_vm9, %v405_v48, %v682_v37  ;;  %v331_v60 = vadd.f32 %v330_v49, %v329_v39 }
 0x103   :  { %v517_v61 = vmul.f32 %v501_v52, %v501_v52  ;;  %v451_v0 = vrot.slane %v423_v53, %v3550_v40  ;;  %v324_v1 = vadd.f32 %v323_v54, %v322_v44  ;;  %v686_v2 = vsel %vm685_vm10, %v406_v43, %v684_v59 }
 0x104   :  { %v516_v26 = vmul.f32 %v500_v57, %v500_v57  ;;  %v447_v4 = vrot.slane %v422_v58, %v3550_v40  ;;  %v3607_v5 = vmul.f32 0.125, %v331_v60  ;;  %v342_v6 = vrot.slane %v341_v55, 2  ;;  %v3609_v7 = vpop.f32.mrb[14].mxu0 }
 0x105   :  { %v539_v31 = vsel %vm289_vm2, %v517_v61, 0.0  ;;  %v503_v9 = vsub.f32 %v3552_v41, %v451_v0  ;;  %v407_v10 = vmul.f32 0.125, %v324_v1  ;;  %v3616_v11 = vsel %vm247_vm12, %v3566_v63, %v263_v50  ;;  %v3618_v14 = vpop.f32.mrb[15].mxu0 }
 0x106   :  { %v540_v15 = vrot.slane %v539_v31, 4  ;;  %v532_v16 = vsel %vm289_vm2, %v516_v26, 0.0  ;;  %v502_v18 = vsub.f32 %v3557_v46, %v447_v4  ;;  %v425_v19 = vmul.f32 %v3578_v13, %v3607_v5 }
 0x107   :  { %v533_v21 = vrot.slane %v532_v16, 4  ;;  %v519_v22 = vmul.f32 %v503_v9, %v503_v9  ;;  %v424_v41 = vmul.f32 %v3578_v13, %v407_v10  ;;  %v3626_v23 = vsel %vm687_vm13, %v407_v10, %v686_v2 }
 0x108   :  { %v541_v24 = vadd.f32 %v540_v15, %v539_v31  ;;  %v518_v63 = vmul.f32 %v502_v18, %v502_v18  ;;  %v459_v25 = vrot.slane %v425_v19, %v3550_v40  ;;  %v343_v30 = vadd.f32 %v342_v6, %v341_v55 }
 0x109   :  { %v534_v32 = vadd.f32 %v533_v21, %v532_v16  ;;  %v553_v33 = vsel %vm289_vm2, %v519_v22, 0.0  ;;  %v455_v46 = vrot.slane %v424_v41, %v3550_v40  ;;  %v332_v34 = vsel %vm289_vm2, %v3616_v11, 0.0 }
 0x10a   :  { %v542_v36 = vrot.slane %v541_v24, 2  ;;  %v554_v37 = vrot.slane %v553_v33, 4  ;;  %v546_v38 = vsel %vm289_vm2, %v518_v63, 0.0  ;;  %v505_v39 = vsub.f32 %v3563_v62, %v459_v25 }
 0x10b   :  { %v535_v42 = vrot.slane %v534_v32, 2  ;;  %v547_v43 = vrot.slane %v546_v38, 4  ;;  %v504_v44 = vsub.f32 %v3570_v3, %v455_v46  ;;  %v344_v45 = vrot.slane %v343_v30, 1 }
 0x10c   :  { %v543_v47 = vadd.f32 %v542_v36, %v541_v24  ;;  %v555_v48 = vadd.f32 %v554_v37, %v553_v33  ;;  %v521_v49 = vmul.f32 %v505_v39, %v505_v39  ;;  %v333_v50 = vrot.slane %v332_v34, 4 }
 0x10d   :  { %v536_v52 = vadd.f32 %v535_v42, %v534_v32  ;;  %v548_v53 = vadd.f32 %v547_v43, %v546_v38  ;;  %v520_v54 = vmul.f32 %v504_v44, %v504_v44  ;;  %v345_v55 = vadd.f32 %v344_v45, %v343_v30 }
 0x10e   :  { %v544_v57 = vrot.slane %v543_v47, 1  ;;  %v556_v58 = vrot.slane %v555_v48, 2  ;;  %v567_v59 = vsel %vm289_vm2, %v521_v49, 0.0  ;;  %v334_v60 = vadd.f32 %v333_v50, %v332_v34 }
 0x10f   :  { %v537_v61 = vrot.slane %v536_v52, 1  ;;  %v549_v62 = vrot.slane %v548_v53, 2  ;;  %v568_v0 = vrot.slane %v567_v59, 4  ;;  %v560_v1 = vsel %vm289_vm2, %v520_v54, 0.0 }
 0x110   :  { %v545_v3 = vadd.f32 %v544_v57, %v543_v47  ;;  %v557_v2 = vadd.f32 %v556_v58, %v555_v48  ;;  %v561_v26 = vrot.slane %v560_v1, 4  ;;  %v3638_v4 = vmul.f32 0.125, %v345_v55 }
 0x111   :  { %v538_v6 = vadd.f32 %v537_v61, %v536_v52  ;;  %v550_v31 = vadd.f32 %v549_v62, %v548_v53  ;;  %v569_v9 = vadd.f32 %v568_v0, %v567_v59  ;;  %v335_v10 = vrot.slane %v334_v60, 2 }
 0x112   :  { %v645_v15 = vmul.f32 0.125, %v545_v3  ;;  %v558_v16 = vrot.slane %v557_v2, 1  ;;  %v562_v18 = vadd.f32 %v561_v26, %v560_v1  ;;  %v427_v19 = vmul.f32 %v3578_v13, %v3638_v4 }
 0x113   :  { %v644_v21 = vmul.f32 0.125, %v538_v6  ;;  %v551_v22 = vrot.slane %v550_v31, 1  ;;  %v570_v41 = vrot.slane %v569_v9, 2  ;;  %v336_v24 = vadd.f32 %v335_v10, %v334_v60 }
 0x114   :  { %v707_v63 = vadd.f32 1e-05, %v645_v15  ;;  %v559_v25 = vadd.f32 %v558_v16, %v557_v2  ;;  %v563_v30 = vrot.slane %v562_v18, 2  ;;  %v467_v32 = vrot.slane %v427_v19, %v3550_v40 }
 0x115   :  { %v706_v33 = vadd.f32 1e-05, %v644_v21  ;;  %v552_v46 = vadd.f32 %v551_v22, %v550_v31  ;;  %v571_v34 = vadd.f32 %v570_v41, %v569_v9  ;;  %v337_v36 = vrot.slane %v336_v24, 1 }
 0x116   :  { %3240 = vrsqrt.f32 %v707_v63  ;;  %v647_v37 = vmul.f32 0.125, %v559_v25  ;;  %v564_v38 = vadd.f32 %v563_v30, %v562_v18  ;;  %v507_v39 = vsub.f32 %v3581_v28, %v467_v32 }
 0x117   :  { %3242 = vrsqrt.f32 %v706_v33  ;;  %v646_v42 = vmul.f32 0.125, %v552_v46  ;;  %v572_v43 = vrot.slane %v571_v34, 1  ;;  %v338_v44 = vadd.f32 %v337_v36, %v336_v24 }
 0x118   :  { %v709_v45 = vadd.f32 1e-05, %v647_v37  ;;  %v565_v47 = vrot.slane %v564_v38, 1  ;;  %v523_v48 = vmul.f32 %v507_v39, %v507_v39  ;;  %v208_v49 = vadd.f32 %v3574_v8, %v3532_v17 }
 0x119   :  { %v708_v50 = vadd.f32 1e-05, %v646_v42  ;;  %v573_v52 = vadd.f32 %v572_v43, %v571_v34  ;;  %v3646_v53 = vmul.f32 0.125, %v338_v44  ;;  %v203_v54 = vadd.f32 %v3532_v17, %v3576_v12 }
 0x11a   :  { %3244 = vrsqrt.f32 %v709_v45  ;;  %v566_v55 = vadd.f32 %v565_v47, %v564_v38  ;;  %v581_v28 = vsel %vm289_vm2, %v523_v48, 0.0  ;;  %vm250_vm14 = vcmp.gt.f32.partialorder %v208_v49, 0.0 }
 0x11b   :  { %3246 = vrsqrt.f32 %v708_v50  ;;  %v649_v57 = vmul.f32 0.125, %v573_v52  ;;  %v582_v58 = vrot.slane %v581_v28, 4  ;;  %v426_v59 = vmul.f32 %v3578_v13, %v3646_v53 }
 0x11c   :  { %v648_v60 = vmul.f32 0.125, %v566_v55  ;;  %v266_v8 = vmul.f32 0.1, %v208_v49  ;;  %vm249_vm15 = vcmp.gt.f32.partialorder %v203_v54, 0.0  ;;  %v265_v61 = vmul.f32 0.1, %v203_v54 }
 0x11d   :  { %v711_v62 = vadd.f32 1e-05, %v649_v57  ;;  %v583_v0 = vadd.f32 %v582_v58, %v581_v28  ;;  %v463_v1 = vrot.slane %v426_v59, %v3550_v40  ;;  %v218_v12 = vadd.f32 %v3583_v29, %v3532_v17 }
 0x11e   :  { %v710_v3 = vadd.f32 1e-05, %v648_v60  ;;  %v3656_v2 = vsel %vm250_vm14, %v208_v49, %v266_v8  ;;  %v3658_v26 = vsel %vm249_vm15, %v203_v54, %v265_v61  ;;  %v213_v6 = vadd.f32 %v3532_v17, %v3588_v35 }
 0x11f   :  { %3248 = vrsqrt.f32 %v711_v62  ;;  %v584_v31 = vrot.slane %v583_v0, 2  ;;  %v506_v9 = vsub.f32 %v3616_v11, %v463_v1  ;;  %v353_v10 = vsel %vm289_vm2, %v3656_v2, 0.0 }
 0x120   :  { %v3665_v15 = vpop.eup %3240  ;;  %3250 = vrsqrt.f32 %v710_v3  ;;  %v354_v16 = vrot.slane %v353_v10, 4  ;;  %v346_v29 = vsel %vm289_vm2, %v3658_v26, 0.0  ;;  %vm252_vm0 = vcmp.gt.f32.partialorder %v218_v12, 0.0 }
 0x121   :  { %v3669_v18 = vpop.eup %3242  ;;  %v585_v19 = vadd.f32 %v584_v31, %v583_v0  ;;  %v522_v21 = vmul.f32 %v506_v9, %v506_v9  ;;  %v347_v35 = vrot.slane %v346_v29, 4  ;;  %v268_v22 = vmul.f32 0.1, %v218_v12 }
 0x122   :  { %v355_v41 = vadd.f32 %v354_v16, %v353_v10  ;;  %vm251_vm1 = vcmp.gt.f32.partialorder %v213_v6, 0.0  ;;  %v267_v11 = vmul.f32 0.1, %v213_v6  ;;  %v228_v24 = vadd.f32 %v3595_v51, %v3532_v17 }
 0x123   :  { %v586_v63 = vrot.slane %v585_v19, 1  ;;  %v574_v25 = vsel %vm289_vm2, %v522_v21, 0.0  ;;  %v348_v30 = vadd.f32 %v347_v35, %v346_v29  ;;  %v3674_v32 = vsel %vm252_vm0, %v218_v12, %v268_v22 }
 0x124   :  { %v3676_v33 = vpop.eup %3244  ;;  %v575_v46 = vrot.slane %v574_v25, 4  ;;  %v356_v34 = vrot.slane %v355_v41, 2  ;;  %v367_v36 = vsel %vm289_vm2, %v3674_v32, 0.0  ;;  %v3680_v37 = vsel %vm251_vm1, %v213_v6, %v267_v11 }
 0x125   :  { %v3682_v38 = vpop.eup %3246  ;;  %v587_v39 = vadd.f32 %v586_v63, %v585_v19  ;;  %v349_v42 = vrot.slane %v348_v30, 2  ;;  %v368_v51 = vrot.slane %v367_v36, 4  ;;  %v360_v43 = vsel %vm289_vm2, %v3680_v37, 0.0 }
 0x126   :  { %v576_v44 = vadd.f32 %v575_v46, %v574_v25  ;;  %v357_v45 = vadd.f32 %v356_v34, %v355_v41  ;;  %v361_v47 = vrot.slane %v360_v43, 4  ;;  %vm254_vm3 = vcmp.gt.f32.partialorder %v228_v24, 0.0 }
 0x127   :  { %v651_v48 = vmul.f32 0.125, %v587_v39  ;;  %v350_v49 = vadd.f32 %v349_v42, %v348_v30  ;;  %v369_v50 = vadd.f32 %v368_v51, %v367_v36  ;;  %v270_v52 = vmul.f32 0.1, %v228_v24 }
 0x128   :  { %v577_v54 = vrot.slane %v576_v44, 2  ;;  %v358_v55 = vrot.slane %v357_v45, 1  ;;  %v362_v28 = vadd.f32 %v361_v47, %v360_v43  ;;  %v223_v57 = vadd.f32 %v3532_v17, %v3599_v56 }
 0x129   :  { %v3688_v58 = vpop.eup %3248  ;;  %v713_v59 = vadd.f32 1e-05, %v651_v48  ;;  %v351_v60 = vrot.slane %v350_v49, 1  ;;  %v370_v8 = vrot.slane %v369_v50, 2  ;;  %v3690_v61 = vsel %vm254_vm3, %v228_v24, %v270_v52 }
 0x12a   :  { %v3692_v62 = vpop.eup %3250  ;;  %v578_v0 = vadd.f32 %v577_v54, %v576_v44  ;;  %v359_v1 = vadd.f32 %v358_v55, %v357_v45  ;;  %v363_v12 = vrot.slane %v362_v28, 2  ;;  %v381_v3 = vsel %vm289_vm2, %v3690_v61, 0.0 }
 0x12b   :  { %3252 = vrsqrt.f32 %v713_v59  ;;  %v352_v6 = vadd.f32 %v351_v60, %v350_v49  ;;  %v371_v31 = vadd.f32 %v370_v8, %v369_v50  ;;  %v382_v9 = vrot.slane %v381_v3, 4 }
 0x12c   :  { %v579_v56 = vrot.slane %v578_v0, 1  ;;  %v412_v10 = vmul.f32 0.125, %v359_v1  ;;  %v364_v16 = vadd.f32 %v363_v12, %v362_v28  ;;  %vm253_vm4 = vcmp.gt.f32.partialorder %v223_v57, 0.0 }
 0x12d   :  { %v411_v29 = vmul.f32 0.125, %v352_v6  ;;  %v372_v19 = vrot.slane %v371_v31, 1  ;;  %v383_v21 = vadd.f32 %v382_v9, %v381_v3  ;;  %v269_v35 = vmul.f32 0.1, %v223_v57 }
 0x12e   :  { %v580_v22 = vadd.f32 %v579_v56, %v578_v0  ;;  %v429_v41 = vmul.f32 %v3578_v13, %v412_v10  ;;  %v365_v11 = vrot.slane %v364_v16, 1  ;;  %v238_v24 = vadd.f32 %v3609_v7, %v3532_v17 }
 0x12f   :  { %v428_v63 = vmul.f32 %v3578_v13, %v411_v29  ;;  %v695_v25 = vsel %vm681_vm6, %v412_v10, %v411_v29  ;;  %v373_v30 = vadd.f32 %v372_v19, %v371_v31  ;;  %v384_v46 = vrot.slane %v383_v21, 2 }
 0x130   :  { %v650_v34 = vmul.f32 0.125, %v580_v22  ;;  %v475_v36 = vrot.slane %v429_v41, %v3550_v40  ;;  %v366_v39 = vadd.f32 %v365_v11, %v364_v16  ;;  %v3703_v42 = vsel %vm253_vm4, %v223_v57, %v269_v35 }
 0x131   :  { %v471_v51 = vrot.slane %v428_v63, %v3550_v40  ;;  %v414_v43 = vmul.f32 0.125, %v373_v30  ;;  %v385_v44 = vadd.f32 %v384_v46, %v383_v21  ;;  %v374_v7 = vsel %vm289_vm2, %v3703_v42, 0.0 }
 0x132   :  { %v712_v45 = vadd.f32 1e-05, %v650_v34  ;;  %v509_v47 = vsub.f32 %v3656_v2, %v475_v36  ;;  %v413_v48 = vmul.f32 0.125, %v366_v39  ;;  %v375_v49 = vrot.slane %v374_v7, 4 }
 0x133   :  { %v508_v50 = vsub.f32 %v3658_v26, %v471_v51  ;;  %v431_v52 = vmul.f32 %v3578_v13, %v414_v43  ;;  %v386_v54 = vrot.slane %v385_v44, 1  ;;  %vm256_vm5 = vcmp.gt.f32.partialorder %v238_v24, 0.0 }
 0x134   :  { %3254 = vrsqrt.f32 %v712_v45  ;;  %v525_v55 = vmul.f32 %v509_v47, %v509_v47  ;;  %v430_v28 = vmul.f32 %v3578_v13, %v413_v48  ;;  %v696_v57 = vsel %vm683_vm9, %v413_v48, %v695_v25 }
 0x135   :  { %v3713_v59 = vpop.eup %3252  ;;  %v524_v60 = vmul.f32 %v508_v50, %v508_v50  ;;  %v483_v8 = vrot.slane %v431_v52, %v3550_v40  ;;  %v387_v2 = vadd.f32 %v386_v54, %v385_v44  ;;  %v376_v0 = vadd.f32 %v375_v49, %v374_v7 }
 0x136   :  { %v595_v1 = vsel %vm289_vm2, %v525_v55, 0.0  ;;  %v479_v26 = vrot.slane %v430_v28, %v3550_v40  ;;  %v697_v12 = vsel %vm685_vm10, %v414_v43, %v696_v57  ;;  %v272_v3 = vmul.f32 0.1, %v238_v24 }
 0x137   :  { %v596_v6 = vrot.slane %v595_v1, 4  ;;  %v588_v31 = vsel %vm289_vm2, %v524_v60, 0.0  ;;  %v511_v9 = vsub.f32 %v3674_v32, %v483_v8  ;;  %v3721_v56 = vmul.f32 0.125, %v387_v2 }
 0x138   :  { %v589_v10 = vrot.slane %v588_v31, 4  ;;  %v510_v16 = vsub.f32 %v3680_v37, %v479_v26  ;;  %v377_v29 = vrot.slane %v376_v0, 2  ;;  %v3725_v19 = vsel %vm256_vm5, %v238_v24, %v272_v3 }
 0x139   :  { %v597_v21 = vadd.f32 %v596_v6, %v595_v1  ;;  %v527_v35 = vmul.f32 %v511_v9, %v511_v9  ;;  %v433_v22 = vmul.f32 %v3578_v13, %v3721_v56  ;;  %v395_v41 = vsel %vm289_vm2, %v3725_v19, 0.0 }
 0x13a   :  { %v590_v11 = vadd.f32 %v589_v10, %v588_v31  ;;  %v526_v63 = vmul.f32 %v510_v16, %v510_v16  ;;  %v378_v32 = vadd.f32 %v377_v29, %v376_v0  ;;  %v396_v25 = vrot.slane %v395_v41, 4 }
 0x13b   :  { %v598_v30 = vrot.slane %v597_v21, 2  ;;  %v609_v46 = vsel %vm289_vm2, %v527_v35, 0.0  ;;  %v491_v37 = vrot.slane %v433_v22, %v3550_v40  ;;  %v233_v24 = vadd.f32 %v3532_v17, %v3618_v14 }
 0x13c   :  { %v591_v34 = vrot.slane %v590_v11, 2  ;;  %v610_v36 = vrot.slane %v609_v46, 4  ;;  %v602_v39 = vsel %vm289_vm2, %v526_v63, 0.0  ;;  %v379_v51 = vrot.slane %v378_v32, 1 }
 0x13d   :  { %v599_v43 = vadd.f32 %v598_v30, %v597_v21  ;;  %v603_v44 = vrot.slane %v602_v39, 4  ;;  %v513_v7 = vsub.f32 %v3690_v61, %v491_v37  ;;  %v397_v45 = vadd.f32 %v396_v25, %v395_v41 }
 0x13e   :  { %v3737_v47 = vpop.eup %3254  ;;  %v592_v48 = vadd.f32 %v591_v34, %v590_v11  ;;  %v611_v49 = vadd.f32 %v610_v36, %v609_v46  ;;  %v380_v50 = vadd.f32 %v379_v51, %v378_v32  ;;  %vm255_vm7 = vcmp.gt.f32.partialorder %v233_v24, 0.0  ;;  %v780_v51 = vld [vmem:[#allocation2 + $0x10] sm:$0xff] }
 0x13f   :  { %v600_v52 = vrot.slane %v599_v43, 1  ;;  %v604_v54 = vadd.f32 %v603_v44, %v602_v39  ;;  %v529_v55 = vmul.f32 %v513_v7, %v513_v7  ;;  %v398_v17 = vrot.slane %v397_v45, 2  ;;  %v779_v39 = vld [vmem:[#allocation2 + $0x8] sm:$0xff] }
 0x140   :  { %v593_v14 = vrot.slane %v592_v48, 1  ;;  %v612_v28 = vrot.slane %v611_v49, 2  ;;  %v415_v57 = vmul.f32 0.125, %v380_v50  ;;  %v271_v60 = vmul.f32 0.1, %v233_v24 }
 0x141   :  { %vm689_vm8 = vcmask 1045509   ;;  %v601_v8 = vadd.f32 %v600_v52, %v599_v43  ;;  %v605_v2 = vrot.slane %v604_v54, 2  ;;  %v623_v61 = vsel %vm289_vm2, %v529_v55, 0.0 }
 0x142   :  { %v399_v0 = vadd.f32 %v398_v17, %v397_v45  ;;  %v594_v1 = vadd.f32 %v593_v14, %v592_v48  ;;  %v613_v26 = vadd.f32 %v612_v28, %v611_v49  ;;  %v624_v3 = vrot.slane %v623_v61, 4  ;;  %v869_v28 = vld [vmem:[#allocation2 + $0x28] sm:$0xff] }
 0x143   :  { %v432_v6 = vmul.f32 %v3578_v13, %v415_v57  ;;  %v653_v31 = vmul.f32 0.125, %v601_v8  ;;  %v606_v9 = vadd.f32 %v605_v2, %v604_v54  ;;  %v698_v10 = vsel %vm687_vm13, %v415_v57, %v697_v12  ;;  %v870_v57 = vld [vmem:[#allocation2 + $0x30] sm:$0xff] }
 0x144   :  { %v400_v16 = vrot.slane %v399_v0, 1  ;;  %v652_v29 = vmul.f32 0.125, %v594_v1  ;;  %v614_v21 = vrot.slane %v613_v26, 1  ;;  %v625_v35 = vadd.f32 %v624_v3, %v623_v61  ;;  %v781_v1 = vld [vmem:[#allocation2 + $0x18] sm:$0xff] }
 0x145   :  { %v487_v22 = vrot.slane %v432_v6, %v3550_v40  ;;  %v715_v41 = vadd.f32 1e-05, %v653_v31  ;;  %v607_v11 = vrot.slane %v606_v9, 1  ;;  %v3744_v32 = vsel %vm255_vm7, %v233_v24, %v271_v60 }
 0x146   :  { %v401_v63 = vadd.f32 %v400_v16, %v399_v0  ;;  %v714_v25 = vadd.f32 1e-05, %v652_v29  ;;  %v615_v30 = vadd.f32 %v614_v21, %v613_v26  ;;  %v626_v46 = vrot.slane %v625_v35, 2  ;;  %v782_v26 = vld [vmem:[#allocation2 + $0x20] sm:$0xff] }
 0x147   :  { %v512_v37 = vsub.f32 %v3703_v42, %v487_v22  ;;  %3256 = vrsqrt.f32 %v715_v41  ;;  %v608_v34 = vadd.f32 %v607_v11, %v606_v9  ;;  %v388_v36 = vsel %vm289_vm2, %v3744_v32, 0.0  ;;  %v953_v11 = vld [vmem:[#allocation2 + $0x48] sm:$0xff] }
 0x148   :  { %v3747_v12 = vmul.f32 0.125, %v401_v63  ;;  %3258 = vrsqrt.f32 %v714_v25  ;;  %v655_v43 = vmul.f32 0.125, %v615_v30  ;;  %v627_v44 = vadd.f32 %v626_v46, %v625_v35  ;;  %v954_v63 = vld [vmem:[#allocation2 + $0x50] sm:$0xff] }
 0x149   :  { %v528_v7 = vmul.f32 %v512_v37, %v512_v37  ;;  %v654_v24 = vmul.f32 0.125, %v608_v34  ;;  %v389_v48 = vrot.slane %v388_v36, 4  ;;  %v3755_v42 = vsel %vm689_vm8, %v3721_v56, %v698_v10  ;;  %v872_v10 = vld [vmem:[#allocation2 + $0x40] sm:$0xff] }
 0x14a   :  { %v435_v45 = vmul.f32 %v3578_v13, %v3747_v12  ;;  %v717_v49 = vadd.f32 1e-05, %v655_v43  ;;  %vm691_vm11 = vcmask 1046534   ;;  %v3117_v52 = vpack.c.bf16 %v780_v51, %v779_v39  ;;  %v2749_v43 = vld [vmem:[#allocation2 + $0x12b] ss:$0 sm:$0xff] }
 0x14b   :  { %v616_v50 = vsel %vm289_vm2, %v528_v7, 0.0  ;;  %v716_v54 = vadd.f32 1e-05, %v654_v24  ;;  %v390_v14 = vadd.f32 %v389_v48, %v388_v36  ;;  %v628_v60 = vrot.slane %v627_v44, 1 }
 0x14c   :  { %v617_v55 = vrot.slane %v616_v50, 4  ;;  %v499_v17 = vrot.slane %v435_v45, %v3550_v40  ;;  %3118 = vmatprep.subr.bf16.mxu0 %v3117_v52  ;;  %v690_v8 = vsel %vm689_vm8, %v3607_v5, %v3626_v23  ;;  %vm693_vm12 = vcmask 1047559  }
 0x14d   :  { %v754_v56 = vsel %vm681_vm6, %v3665_v15, %v3669_v18  ;;  %3260 = vrsqrt.f32 %v716_v54  ;;  %v391_v0 = vrot.slane %v390_v14, 2  ;;  %3120 = vmatpush3.bf16.msra.mxu0 %v3117_v52  ;;  %v692_v3 = vsel %vm691_vm11, %v3646_v53, %v690_v8  ;;  %v3770_v15 = vld [vmem:[#allocation2 + $0x12a] ss:$0 sm:$0xff] }
 0x14e   :  { %v618_v2 = vadd.f32 %v617_v55, %v616_v50  ;;  %v515_v61 = vsub.f32 %v3725_v19, %v499_v17  ;;  %3262 = vrsqrt.f32 %v717_v49  ;;  %v755_v5 = vsel %vm683_vm9, %v3682_v38, %v754_v56  ;;  %v871_v19 = vld [vmem:[#allocation2 + $0x38] sm:$0xff] }
 0x14f   :  { %v3125_v23 = vpack.c.bf16 %v870_v57, %v869_v28  ;;  %v392_v9 = vadd.f32 %v391_v0, %v390_v14  ;;  %v694_v18 = vsel %vm693_vm12, %v3638_v4, %v692_v3  ;;  %v629_v16 = vadd.f32 %v628_v60, %v627_v44 }
 0x150   :  { %v619_v6 = vrot.slane %v618_v2, 2  ;;  %v531_v31 = vmul.f32 %v515_v61, %v515_v61  ;;  %v756_v29 = vsel %vm685_vm10, %v3676_v33, %v755_v5  ;;  %v3121_v53 = vpack.c.bf16 %v782_v26, %v781_v1 }
 0x151   :  { %3126 = vmatprep.subr.bf16.mxu1 %v3125_v23  ;;  %v3257_v21 = vpop.eup %3256  ;;  %v393_v22 = vrot.slane %v392_v9, 1  ;;  %v757_v41 = vsel %vm687_vm13, %v3692_v62, %v756_v29  ;;  %v704_v30 = vmul.f32 %v3770_v15, %v694_v18  ;;  %v3129_v46 = vpack.c.bf16 %v872_v10, %v871_v19 }
 0x152   :  { %v620_v35 = vadd.f32 %v619_v6, %v618_v2  ;;  %v637_v38 = vsel %vm289_vm2, %v531_v31, 0.0  ;;  %3128 = vmatpush3.bf16.msra.mxu1 %v3125_v23  ;;  %v3259_v4 = vpop.eup %3258  ;;  %v758_v33 = vsel %vm689_vm8, %v3688_v58, %v757_v41  ;;  %3122 = vmatprep.subr.bf16.mxu0 %v3121_v53  ;;  %v657_v62 = vmul.f32 0.125, %v629_v16 }
 0x153   :  { %v638_v25 = vrot.slane %v637_v38, 4  ;;  %v394_v34 = vadd.f32 %v393_v22, %v392_v9  ;;  %v759_v36 = vsel %vm691_vm11, %v3737_v47, %v758_v33  ;;  %v761_v39 = vsel %vm681_vm6, %v3257_v21, %v3259_v4  ;;  %3124 = vmatpush3.bf16.msra.mxu0 %v3121_v53  ;;  %3130 = vmatprep.subr.bf16.mxu1 %v3129_v46 }
 0x154   :  { %v621_v37 = vrot.slane %v620_v35, 1  ;;  %v760_v51 = vsel %vm693_vm12, %v3713_v59, %v759_v36  ;;  %v3133_v44 = vpack.c.bf16 %v954_v63, %v953_v11  ;;  %v719_v59 = vadd.f32 1e-05, %v657_v62  ;;  %v2750_v63 = vld [vmem:[#allocation2 + $0x12c] ss:$0 sm:$0xff] }
 0x155   :  { %v639_v24 = vadd.f32 %v638_v25, %v637_v38  ;;  %v417_v58 = vmul.f32 0.125, %v394_v34  ;;  %v770_v45 = vmul.f32 %v760_v51, %v704_v30  ;;  %v956_v38 = vld [vmem:[#allocation2 + $0x60] sm:$0xff]  ;;  %vm1143_vm14 = vcmask 130048  }
 0x156   :  { %v622_v7 = vadd.f32 %v621_v37, %v620_v35  ;;  %3132 = vmatpush3.bf16.msra.mxu1 %v3129_v46  ;;  %v955_v35 = vld [vmem:[#allocation2 + $0x58] sm:$0xff]  ;;  %vm3436_vm0 = vmmov 0   ;;  %vm2721_vm1 = vcmask 162816  }
 0x157   :  { %3134 = vmatprep.subr.bf16.mxu1 %v3133_v44  ;;  %v3261_v48 = vpop.eup %3260  ;;  %v434_v47 = vmul.f32 %v3578_v13, %v417_v58  ;;  %v700_v50 = vsel %vm691_vm11, %v417_v58, %v3755_v42  ;;  %v3790_v52 = vadd.f32 %v2749_v43, %v770_v45  ;;  %v640_v28 = vrot.slane %v639_v24, 2 }
 0x158   :  { %v656_v49 = vmul.f32 0.125, %v622_v7  ;;  %v3263_v54 = vpop.eup %3262  ;;  %v701_v55 = vsel %vm693_vm12, %v3747_v12, %v700_v50  ;;  %v762_v17 = vsel %vm683_vm9, %v3261_v48, %v761_v39  ;;  %v3137_v11 = vpack.c.bf16 %v956_v38, %v955_v35  ;;  %v2756_v39 = vld [vmem:[#allocation2 + $0x12e] ss:$0 sm:$0xff]  ;;  %v1265_v38 = vld [vmem:[#allocation2 + $0x78] sm:$0xff] }
 0x159   :  { %v495_v57 = vrot.slane %v434_v47, %v3550_v40  ;;  %v763_v60 = vsel %vm685_vm10, %v3263_v54, %v762_v17  ;;  %2938 = vmatprep.mubr.msk.f32.mxu0 %vm289_vm2, %v3790_v52  ;;  %2949 = vmatprep.mubr.msk.f32.mxu1 %vm289_vm2, %v3790_v52  ;;  %v641_v42 = vadd.f32 %v640_v28, %v639_v24  ;;  %vm1037_vm9 = vcmask 523264  }
 0x15a   :  { %v718_v14 = vadd.f32 1e-05, %v656_v49  ;;  %v705_v29 = vmul.f32 %v3770_v15, %v701_v55  ;;  %v2753_v15 = vld [vmem:[#allocation2 + $0x12d] ss:$0 sm:$0xff]  ;;  %vm3142_vm10 = vmpackc.low %vm1037_vm9, %vm1037_vm9  ;;  %v1131_v58 = vand.u32 127, %v436_v20  ;;  %v1127_v45 = vadd.s32 8, %v3539_v27 }
 0x15b   :  { %v514_v13 = vsub.f32 %v3744_v32, %v495_v57  ;;  %v642_v2 = vrot.slane %v641_v42, 1  ;;  %v1128_v49 = vcvt.s32.f32 %v3539_v27 }
 0x15c   :  { %3264 = vrsqrt.f32 %v718_v14  ;;  %v1132_v48 = vcvt.s32.f32 %v1131_v58  ;;  %v1129_v47 = vcvt.s32.f32 %v1127_v45 }
 0x15d   :  { %3266 = vrsqrt.f32 %v719_v59  ;;  %v530_v12 = vmul.f32 %v514_v13, %v514_v13  ;;  %v643_v1 = vadd.f32 %v642_v2, %v641_v42  ;;  %v1133_v54 = vmul.f32 0.125, %v1128_v49 }
 0x15e   :  { %v1137_v50 = vmul.f32 0.125, %v1132_v48  ;;  %v1134_v59 = vmul.f32 0.125, %v1129_v47 }
 0x15f   :  { %v630_v8 = vsel %vm289_vm2, %v530_v12, 0.0  ;;  %v659_v31 = vmul.f32 0.125, %v643_v1  ;;  %v1135_v17 = vfloor.f32 %v1133_v54 }
 0x160   :  { %v631_v56 = vrot.slane %v630_v8, 4  ;;  %v1138_v55 = vfloor.f32 %v1137_v50  ;;  %v1136_v14 = vfloor.f32 %v1134_v59 }
 0x161   :  { %v721_v18 = vadd.f32 1e-05, %v659_v31 }
 0x162   :  { %v632_v61 = vadd.f32 %v631_v56, %v630_v8  ;;  %vm1140_vm15 = vcmp.eq.f32.partialorder %v1136_v14, %v1138_v55 }
 0x164   :  { %v633_v40 = vrot.slane %v632_v61, 2 }
 0x166   :  { %v3265_v0 = vpop.eup %3264  ;;  %v634_v3 = vadd.f32 %v633_v40, %v632_v61 }
 0x167   :  { %v3267_v26 = vpop.eup %3266  ;;  %v764_v5 = vsel %vm687_vm13, %v3265_v0, %v763_v60  ;;  %vm1139_vm13 = vcmp.eq.f32.partialorder %v1135_v17, %v1138_v55 }
 0x168   :  { %v765_v23 = vsel %vm689_vm8, %v3267_v26, %v764_v5  ;;  %v635_v6 = vrot.slane %v634_v3, 1  ;;  %v1264_v5 = vld [vmem:[#allocation2 + $0x70] sm:$0xff] }
 0x16a   :  { %v636_v32 = vadd.f32 %v635_v6, %v634_v3  ;;  %v1263_v3 = vld [vmem:[#allocation2 + $0x68] sm:$0xff]  ;;  %v3435_v6 = vmov 0.0|0.0  }
 0x16b   :  { %3159 = vmatprep.subr.bf16.mxu0 %v3435_v6  ;;  %v3151_v31 = vpack.c.bf16 %v1264_v5, %v1263_v3 }
 0x16c   :  { %v658_v9 = vmul.f32 0.125, %v636_v32  ;;  %v1348_v32 = vld [vmem:[#allocation2 + $0x90] sm:$0xff] }
 0x16e   :  { %v720_v19 = vadd.f32 1e-05, %v658_v9 }
 0x170   :  { %3268 = vrsqrt.f32 %v720_v19  ;;  %v1350_v19 = vld [vmem:[#allocation2 + $0xa0] sm:$0xff] }
 0x171   :  { %3270 = vrsqrt.f32 %v721_v18  ;;  %v1349_v18 = vld [vmem:[#allocation2 + $0x98] sm:$0xff] }
 0x17a   :  { %v3269_v10 = vpop.eup %3268 }
 0x17b   :  { %v3271_v16 = vpop.eup %3270  ;;  %v766_v53 = vsel %vm691_vm11, %v3269_v10, %v765_v23  ;;  %v1347_v23 = vld [vmem:[#allocation2 + $0x88] sm:$0xff]  ;;  %v3834_v10 = vpack.c.bf16 %v1350_v19, %v1349_v18 }
 0x17c   :  { %v767_v21 = vsel %vm693_vm12, %v3271_v16, %v766_v53  ;;  %v3830_v9 = vpack.c.bf16 %v1348_v32, %v1347_v23  ;;  %v3437_v16 = vmov 0.0  }
 0x17d   :  { %v771_v22 = vmul.f32 %v767_v21, %v705_v29 }
 0x17f   :  { %v3808_v41 = vadd.f32 %v2749_v43, %v771_v22  ;;  %v1266_v22 = vld [vmem:[#allocation2 + $0x80] sm:$0xff] }
 0x181   :  { %2939 = vmatmul.mubr.msk.f32.vlgmr.msra.gmra.mrb[16].mxu0 %vm289_vm2, %v3808_v41  ;;  %2950 = vmatmul.mubr.msk.f32.vlgmr.msra.gmra.mrb[0].mxu1 %vm289_vm2, %v3808_v41 }
 0x182   :  { %3136 = vmatpush3.bf16.msra.mxu1 %v3133_v44  ;;  %2960 = vmatprep.mubr.msk.f32.mxu1 %vm289_vm2, %v3790_v52 }
 0x183   :  { %3138 = vmatprep.subr.bf16.mxu1 %v3137_v11  ;;  %3161 = vmatpush3.bf16.msra.mxu0 %v3830_v9 }
 0x184   :  { %3162 = vmatprep.subr.bf16.mxu0 %v3435_v6  ;;  %2996 = vmatprep.mubr.msk.f32.mxu0 %vm3436_vm0, %v3437_v16 }
 0x186   :  { %3140 = vmatpush3.bf16.msra.mxu1 %v3137_v11 }
 0x187   :  { %3164 = vmatpush3.bf16.msra.mxu0 %v3834_v10 }
 0x188   :  { %3171 = vmatprep.subr.bf16.mxu0 %v3435_v6 }
 0x189   :  { %2961 = vmatmul.mubr.msk.f32.vlgmr.msra.gmra.mrb[2].mxu1 %vm289_vm2, %v3808_v41 }
 0x18a   :  { %2997 = vmatmul.mubr.f32.vlgmr.msra.gmra.mrb[18].mxu0 %v3437_v16 }
 0x18b   :  { %3173 = vmatpush3.bf16.msra.mxu0 %v3830_v9  ;;  %3018 = vmatprep.mubr.msk.f32.mxu0 %vm3436_vm0, %v3437_v16 }
 0x18c   :  { %3174 = vmatprep.subr.bf16.mxu0 %v3435_v6 }
 0x18f   :  { %3176 = vmatpush3.bf16.msra.mxu0 %v3834_v10 }
 0x190   :  { %3183 = vmatprep.subr.bf16.mxu0 %v3435_v6 }
 0x254   :  { %v2940_v4 = vpop.f32.mrb[16].mxu0  ;;  %v2951_v25 = vpop.f32.mrb[0].mxu1 }
 0x255   :  { %v950_v30 = vadd.f32 %v2951_v25, %v2753_v15  ;;  %v860_v33 = vpop.f32.mrb[17].mxu0  ;;  %v944_v46 = vpop.f32.mrb[1].mxu1  ;;  %v866_v7 = vadd.f32 %v2940_v4, %v2750_v63 }
 0x256   :  { %v861_v37 = vadd.f32 %v2750_v63, %v860_v33  ;;  %v945_v34 = vadd.f32 %v2753_v15, %v944_v46  ;;  %v3155_v63 = vpack.c.bf16 %v1266_v22, %v1265_v38 }
 0x258   :  { %v3141_v36 = vpack.c.bf16 %v950_v30, %v945_v34  ;;  %2967 = vmatprep.mubr.msk.f32.mxu1 %vm1037_vm9, %v861_v37 }
 0x25a   :  { %3143 = vmatprep.subr.msk.bf16.mxu1 %vm3142_vm10, %v3141_v36 }
 0x25b   :  { %3146 = vmatpush3.bf16.xpose.msk.msra.mxu1 %vm3142_vm10, %v3141_v36 }
 0x25c   :  { %v2962_v62 = vpop.f32.mrb[2].mxu1 }
 0x25d   :  { %v1034_v51 = vadd.f32 %v2962_v62, %v2756_v39  ;;  %v1028_v43 = vpop.f32.mrb[3].mxu1  ;;  %v1420_v4 = vpop.f32.mrb[18].mxu0  ;;  %v2765_v62 = vld [vmem:[#allocation2 + $0x12f] ss:$0 sm:$0xff] }
 0x25e   :  { %v1029_v44 = vadd.f32 %v2756_v39, %v1028_v43  ;;  %v1425_v43 = vrot.slane %v1420_v4, 1 }
 0x260   :  { %v3147_v24 = vpack.c.bf16 %v1034_v51, %v1029_v44 }
 0x262   :  { %3148 = vmatprep.subr.bf16.mxu1 %v3147_v24  ;;  %2968 = vmatmul.mubr.msk.f32.vlgmr.msra.gmra.mrb[4].mxu1 %vm1037_vm9, %v866_v7 }
 0x263   :  { %3150 = vmatpush3.bf16.msra.mxu1 %v3147_v24 }
 0x264   :  { %3152 = vmatprep.subr.bf16.mxu1 %v3151_v31 }
 0x335   :  { %v2969_v28 = vpop.f32.mrb[4].mxu1 }
 0x336   :  { %v1116_v57 = vpop.f32.mrb[5].mxu1  ;;  %v1142_v13 = vsel %vm1140_vm15, %v2969_v28, -1e+30 }
 0x337   :  { %v1141_v60 = vsel %vm1139_vm13, %v1116_v57, -1e+30  ;;  %v1147_v42 = vsel %vm1143_vm14, %v1142_v13, -inf }
 0x338   :  { %v1144_v20 = vsel %vm1143_vm14, %v1141_v60, -inf }
 0x339   :  { %1145 = vmax.xlane.f32.xlu0 %v1144_v20 }
 0x33d   :  { %1148 = vmax.xlane.f32.xlu0 %v1147_v42 }
 0x3c6   :  { %v1146_v27 = vpop.xlane.xlu0 %1145 }
 0x3c7   :  { %v1150_v12 = vsub.f32 %v1141_v60, %v1146_v27 }
 0x3c9   :  { %v1152_v8 = vmul.f32 1.442695, %v1150_v12 }
 0x3ca   :  { %v1149_v56 = vpop.xlane.xlu0 %1148 }
 0x3cb   :  { %3272 = vpow2.f32 %v1152_v8  ;;  %v1151_v2 = vsub.f32 %v1142_v13, %v1149_v56 }
 0x3cd   :  { %v1154_v61 = vmul.f32 1.442695, %v1151_v2 }
 0x3cf   :  { %3274 = vpow2.f32 %v1154_v61 }
 0x3d5   :  { %v3273_v40 = vpop.eup %3272 }
 0x3d6   :  { %v1156_v0 = vsel %vm1143_vm14, %v3273_v40, 0.0 }
 0x3d7   :  { %1157 = vadd.xlane.f32.xlu1 %v1156_v0 }
 0x3d9   :  { %v3275_v1 = vpop.eup %3274 }
 0x3da   :  { %v1159_v26 = vsel %vm1143_vm14, %v3275_v1, 0.0 }
 0x3db   :  { %1160 = vadd.xlane.f32.xlu1 %v1159_v26 }
 0x464   :  { %v1158_v29 = vpop.xlane.xlu1 %1157 }
 0x465   :  { %3276 = vrcp.f32 %v1158_v29 }
 0x468   :  { %v1161_v53 = vpop.xlane.xlu1 %1160 }
 0x469   :  { %3278 = vrcp.f32 %v1161_v53 }
 0x46f   :  { %v3277_v21 = vpop.eup %3276 }
 0x470   :  { %v3847_v35 = vmul.f32 %v3277_v21, %v3273_v40 }
 0x472   :  { %2974 = vmatprep.mubr.msk.f32.mxu1 %vm1143_vm14, %v3847_v35 }
 0x473   :  { %v3279_v11 = vpop.eup %3278 }
 0x474   :  { %v3851_v15 = vmul.f32 %v3279_v11, %v3275_v1 }
 0x476   :  { %2975 = vmatmul.mubr.msk.f32.vlgmr.msra.gmra.mrb[6].mxu1 %vm1143_vm14, %v3851_v15 }
 0x477   :  { %3154 = vmatpush3.bf16.msra.mxu1 %v3151_v31  ;;  %2985 = vmatprep.mubr.msk.f32.mxu1 %vm289_vm2, %v3790_v52  ;;  %v2998_v52 = vpop.f32.mrb[19].mxu0 }
 0x478   :  { %3156 = vmatprep.subr.bf16.mxu1 %v3155_v63 }
 0x47b   :  { %3158 = vmatpush3.bf16.msra.mxu1 %v3155_v63 }
 0x47c   :  { %3165 = vmatprep.subr.bf16.mxu1 %v3435_v6 }
 0x47e   :  { %2986 = vmatmul.mubr.msk.f32.vlgmr.msra.gmra.mrb[8].mxu1 %vm289_vm2, %v3808_v41 }
 0x47f   :  { %3167 = vmatpush3.bf16.msra.mxu1 %v3830_v9  ;;  %3007 = vmatprep.mubr.msk.f32.mxu1 %vm3436_vm0, %v3437_v16 }
 0x480   :  { %3168 = vmatprep.subr.bf16.mxu1 %v3435_v6 }
 0x483   :  { %3170 = vmatpush3.bf16.msra.mxu1 %v3834_v10 }
 0x484   :  { %3177 = vmatprep.subr.bf16.mxu1 %v3435_v6 }
 0x549   :  { %v2976_v25 = vpop.f32.mrb[6].mxu1 }
 0x54a   :  { %v1254_v30 = vsel %vm1037_vm9, %v2976_v25, 0.0  ;;  %v1238_v33 = vpop.f32.mrb[7].mxu1 }
 0x54b   :  { %v1255_v46 = vrot.slane %v1254_v30, 4  ;;  %v1247_v41 = vsel %vm1037_vm9, %v1238_v33, 0.0 }
 0x54c   :  { %v1248_v37 = vrot.slane %v1247_v41, 4 }
 0x54d   :  { %v1256_v34 = vadd.f32 %v1255_v46, %v1254_v30 }
 0x54e   :  { %v1249_v36 = vadd.f32 %v1248_v37, %v1247_v41 }
 0x54f   :  { %v1257_v39 = vrot.slane %v1256_v34, 2 }
 0x550   :  { %v1250_v51 = vrot.slane %v1249_v36, 2 }
 0x551   :  { %v1258_v44 = vadd.f32 %v1257_v39, %v1256_v34  ;;  %v2987_v7 = vpop.f32.mrb[8].mxu1 }
 0x552   :  { %v1251_v24 = vadd.f32 %v1250_v51, %v1249_v36  ;;  %v3868_v58 = vadd.f32 %v2987_v7, %v2765_v62  ;;  %v1338_v45 = vpop.f32.mrb[9].mxu1 }
 0x553   :  { %v1259_v48 = vrot.slane %v1258_v44, 1  ;;  %v3870_v49 = vadd.f32 %v2765_v62, %v1338_v45 }
 0x554   :  { %v1252_v47 = vrot.slane %v1251_v24, 1  ;;  %v1429_v50 = vadd.f32 %v1425_v43, %v3868_v58 }
 0x555   :  { %v1260_v54 = vadd.f32 %v1259_v48, %v1258_v44  ;;  %v1428_v59 = vadd.f32 %v1420_v4, %v3870_v49 }
 0x556   :  { %v1253_v55 = vadd.f32 %v1252_v47, %v1251_v24  ;;  %3280 = vtanh.f32 %v1429_v50  ;;  %v2769_v20 = vmul.f32 -1.442695, %v1429_v50 }
 0x557   :  { %v1262_v17 = vmul.f32 0.125, %v1260_v54  ;;  %3282 = vtanh.f32 %v1428_v59  ;;  %v2768_v13 = vmul.f32 -1.442695, %v1428_v59 }
 0x558   :  { %v1261_v14 = vmul.f32 0.125, %v1253_v55  ;;  %3284 = vpow2.f32 %v2769_v20 }
 0x559   :  { %3286 = vpow2.f32 %v2768_v13 }
 0x55a   :  { %v3875_v28 = vsel %vm681_vm6, %v1262_v17, %v1261_v14 }
 0x560   :  { %v3281_v57 = vpop.eup %3280 }
 0x561   :  { %v3283_v60 = vpop.eup %3282  ;;  %1450 = vrot.lane.b32.xlu0 %v3281_v57, %s3438_s0 }
 0x562   :  { %1448 = vrot.lane.b32.xlu1 %v3283_v60, %s3438_s0  ;;  %v3285_v42 = vpop.eup %3284 }
 0x563   :  { %v1437_v27 = vadd.f32 1.0, %v3285_v42  ;;  %v3287_v12 = vpop.eup %3286 }
 0x564   :  { %v1436_v8 = vadd.f32 1.0, %v3287_v12 }
 0x565   :  { %3288 = vrcp.f32 %v1437_v27 }
 0x566   :  { %3290 = vrcp.f32 %v1436_v8 }
 0x56f   :  { %v3289_v56 = vpop.eup %3288 }
 0x570   :  { %v3291_v0 = vpop.eup %3290  ;;  %v1445_v26 = vmul.f32 0.0, %v3289_v56 }
 0x571   :  { %v1444_v23 = vmul.f32 0.0, %v3291_v0 }
 0x5d3   :  { %v1451_v2 = vpop.permute.xlu0 %1450 }
 0x5d4   :  { %v1455_v61 = vmul.f32 %v3289_v56, %v1451_v2  ;;  %v1449_v40 = vpop.permute.xlu1 %1448 }
 0x5d5   :  { %v1454_v1 = vmul.f32 %v3291_v0, %v1449_v40 }
 0x5d6   :  { %1460 = vrot.lane.b32.xlu1 %v1455_v61, %s3438_s0 }
 0x5da   :  { %1458 = vrot.lane.b32.xlu1 %v1454_v1, %s3438_s0 }
 0x648   :  { %v1461_v3 = vpop.permute.xlu1 %1460 }
 0x649   :  { %v1465_v5 = vadd.f32 %v1461_v3, %v1445_v26 }
 0x64b   :  { %3292 = vtanh.f32 %v1465_v5  ;;  %v1579_v47 = vrot.slane %v1465_v5, 7 }
 0x64c   :  { %v1459_v31 = vpop.permute.xlu1 %1458 }
 0x64d   :  { %v1464_v32 = vadd.f32 %v1459_v31, %v1444_v23 }
 0x64f   :  { %3294 = vtanh.f32 %v1464_v32  ;;  %v1578_v54 = vrot.slane %v1464_v32, 7 }
 0x655   :  { %v3293_v18 = vpop.eup %3292 }
 0x656   :  { %1472 = vrot.lane.b32.xlu0 %v3293_v18, %s3438_s0 }
 0x659   :  { %v3295_v19 = vpop.eup %3294 }
 0x65a   :  { %1470 = vrot.lane.b32.xlu1 %v3295_v19, %s3438_s0 }
 0x6c8   :  { %v1473_v29 = vpop.permute.xlu0 %1472 }
 0x6c9   :  { %v1477_v53 = vmul.f32 %v3289_v56, %v1473_v29 }
 0x6cb   :  { %v1480_v38 = vrot.slane %v1477_v53, 7 }
 0x6cc   :  { %v1471_v21 = vpop.permute.xlu1 %1470 }
 0x6cd   :  { %v1476_v22 = vmul.f32 %v3291_v0, %v1471_v21 }
 0x6cf   :  { %v1481_v11 = vsel %vm681_vm6, %v1480_v38, %v1476_v22 }
 0x6d0   :  { %1482 = vrot.lane.b32.xlu0 %v1481_v11, %s3439_s26 }
 0x742   :  { %v1483_v63 = vpop.permute.xlu0 %1482 }
 0x743   :  { %3008 = vmatmul.mubr.msk.f32.vlgmr.msra.gmra.mrb[10].mxu1 %vm289_vm2, %v1483_v63 }
 0x744   :  { %3179 = vmatpush3.bf16.msra.mxu1 %v3830_v9  ;;  %3029 = vmatprep.mubr.msk.f32.mxu1 %vm3436_vm0, %v3437_v16 }
 0x745   :  { %3180 = vmatprep.subr.bf16.mxu1 %v3435_v6 }
 0x748   :  { %3182 = vmatpush3.bf16.msra.mxu1 %v3834_v10 }
 0x749   :  { %3189 = vmatprep.subr.bf16.mxu1 %v3435_v6 }
 0x816   :  { %v1552_v4 = vpop.f32.mrb[10].mxu1 }
 0x817   :  { %v1557_v52 = vrot.slane %v1552_v4, 7  ;;  %v1561_v25 = vadd.f32 %v1552_v4, %v3868_v58  ;;  %v3009_v30 = vpop.f32.mrb[11].mxu1 }
 0x819   :  { %v1560_v33 = vadd.f32 %v1557_v52, %v3870_v49  ;;  %3296 = vtanh.f32 %v1561_v25  ;;  %v2772_v37 = vmul.f32 -1.442695, %v1561_v25 }
 0x81b   :  { %3298 = vtanh.f32 %v1560_v33  ;;  %v2771_v34 = vmul.f32 -1.442695, %v1560_v33 }
 0x81c   :  { %3300 = vpow2.f32 %v2772_v37 }
 0x81d   :  { %3302 = vpow2.f32 %v2771_v34 }
 0x823   :  { %v3297_v46 = vpop.eup %3296 }
 0x824   :  { %1588 = vrot.lane.b32.xlu0 %v3297_v46, %s3438_s0 }
 0x825   :  { %v3299_v41 = vpop.eup %3298 }
 0x826   :  { %1586 = vrot.lane.b32.xlu1 %v3299_v41, %s3438_s0  ;;  %v3301_v36 = vpop.eup %3300 }
 0x827   :  { %v3303_v39 = vpop.eup %3302  ;;  %v1569_v62 = vadd.f32 1.0, %v3301_v36 }
 0x828   :  { %v1568_v51 = vadd.f32 1.0, %v3303_v39 }
 0x829   :  { %3304 = vrcp.f32 %v1569_v62 }
 0x82a   :  { %3306 = vrcp.f32 %v1568_v51 }
 0x833   :  { %v3305_v43 = vpop.eup %3304 }
 0x834   :  { %v3307_v24 = vpop.eup %3306  ;;  %v1583_v50 = vmul.f32 %v3305_v43, %v1579_v47 }
 0x835   :  { %v1582_v17 = vmul.f32 %v3307_v24, %v1578_v54 }
 0x896   :  { %v1589_v44 = vpop.permute.xlu0 %1588 }
 0x897   :  { %v1593_v7 = vmul.f32 %v3305_v43, %v1589_v44 }
 0x898   :  { %v1587_v45 = vpop.permute.xlu1 %1586 }
 0x899   :  { %1598 = vrot.lane.b32.xlu0 %v1593_v7, %s3438_s0  ;;  %v1592_v48 = vmul.f32 %v3307_v24, %v1587_v45 }
 0x89b   :  { %1596 = vrot.lane.b32.xlu1 %v1592_v48, %s3438_s0 }
 0x90b   :  { %v1599_v59 = vpop.permute.xlu0 %1598 }
 0x90c   :  { %v1603_v55 = vadd.f32 %v1599_v59, %v1583_v50 }
 0x90d   :  { %v1597_v14 = vpop.permute.xlu1 %1596 }
 0x90e   :  { %3308 = vtanh.f32 %v1603_v55  ;;  %v1602_v57 = vadd.f32 %v1597_v14, %v1582_v17  ;;  %v1718_v25 = vrot.slane %v1603_v55, 7 }
 0x910   :  { %3310 = vtanh.f32 %v1602_v57  ;;  %v1717_v52 = vrot.slane %v1602_v57, 7 }
 0x918   :  { %v3309_v60 = vpop.eup %3308 }
 0x919   :  { %1610 = vrot.lane.b32.xlu0 %v3309_v60, %s3438_s0 }
 0x91a   :  { %v3311_v20 = vpop.eup %3310 }
 0x91b   :  { %1608 = vrot.lane.b32.xlu1 %v3311_v20, %s3438_s0 }
 0x98b   :  { %v1611_v13 = vpop.permute.xlu0 %1610 }
 0x98c   :  { %v1615_v12 = vmul.f32 %v3305_v43, %v1611_v13 }
 0x98d   :  { %v1609_v42 = vpop.permute.xlu1 %1608 }
 0x98e   :  { %v1614_v27 = vmul.f32 %v3307_v24, %v1609_v42 }
 0x990   :  { %v1618_v8 = vrot.slane %v1614_v27, 1 }
 0x992   :  { %v1619_v56 = vsel %vm681_vm6, %v1615_v12, %v1618_v8 }
 0x993   :  { %1620 = vrot.lane.b32.xlu1 %v1619_v56, %s3439_s26 }
 0xa05   :  { %v1621_v2 = vpop.permute.xlu1 %1620 }
 0xa06   :  { %3019 = vmatmul.mubr.msk.f32.vlgmr.msra.gmra.mrb[20].mxu0 %vm289_vm2, %v1621_v2 }
 0xa07   :  { %3185 = vmatpush3.bf16.msra.mxu0 %v3830_v9  ;;  %3040 = vmatprep.mubr.msk.f32.mxu0 %vm3436_vm0, %v3437_v16 }
 0xa08   :  { %3186 = vmatprep.subr.bf16.mxu0 %v3435_v6 }
 0xa0b   :  { %3188 = vmatpush3.bf16.msra.mxu0 %v3834_v10 }
 0xa0c   :  { %3195 = vmatprep.subr.bf16.mxu0 %v3435_v6 }
 0xad9   :  { %v1690_v61 = vpop.f32.mrb[20].mxu0 }
 0xada   :  { %v1695_v40 = vrot.slane %v1690_v61, 6  ;;  %v1696_v0 = vrot.slane %v1690_v61, 7  ;;  %v3020_v1 = vpop.f32.mrb[21].mxu0 }
 0xadc   :  { %v1699_v26 = vadd.f32 %v1695_v40, %v3870_v49  ;;  %v1700_v3 = vadd.f32 %v1696_v0, %v3868_v58 }
 0xade   :  { %3312 = vtanh.f32 %v1699_v26  ;;  %v2774_v31 = vmul.f32 -1.442695, %v1699_v26  ;;  %v2775_v32 = vmul.f32 -1.442695, %v1700_v3 }
 0xadf   :  { %3314 = vtanh.f32 %v1700_v3 }
 0xae0   :  { %3316 = vpow2.f32 %v2774_v31 }
 0xae1   :  { %3318 = vpow2.f32 %v2775_v32 }
 0xae8   :  { %v3313_v5 = vpop.eup %3312 }
 0xae9   :  { %v3315_v23 = vpop.eup %3314  ;;  %1725 = vrot.lane.b32.xlu0 %v3313_v5, %s3438_s0 }
 0xaea   :  { %1727 = vrot.lane.b32.xlu1 %v3315_v23, %s3438_s0  ;;  %v3317_v18 = vpop.eup %3316 }
 0xaeb   :  { %v3319_v19 = vpop.eup %3318  ;;  %v1707_v29 = vadd.f32 1.0, %v3317_v18 }
 0xaec   :  { %v1708_v53 = vadd.f32 1.0, %v3319_v19 }
 0xaed   :  { %3320 = vrcp.f32 %v1707_v29 }
 0xaee   :  { %3322 = vrcp.f32 %v1708_v53 }
 0xaf7   :  { %v3321_v21 = vpop.eup %3320 }
 0xaf8   :  { %v3323_v22 = vpop.eup %3322  ;;  %v1721_v30 = vmul.f32 %v3321_v21, %v1717_v52 }
 0xaf9   :  { %v1722_v33 = vmul.f32 %v3323_v22, %v1718_v25 }
 0xb5b   :  { %v1726_v38 = vpop.permute.xlu0 %1725 }
 0xb5c   :  { %v1728_v11 = vpop.permute.xlu1 %1727  ;;  %v1731_v63 = vmul.f32 %v3321_v21, %v1726_v38 }
 0xb5d   :  { %v1732_v4 = vmul.f32 %v3323_v22, %v1728_v11 }
 0xb5e   :  { %1735 = vrot.lane.b32.xlu0 %v1731_v63, %s3438_s0 }
 0xb5f   :  { %1737 = vrot.lane.b32.xlu1 %v1732_v4, %s3438_s0 }
 0xbd0   :  { %v1736_v46 = vpop.permute.xlu0 %1735 }
 0xbd1   :  { %v1738_v41 = vpop.permute.xlu1 %1737  ;;  %v1741_v37 = vadd.f32 %v1736_v46, %v1721_v30 }
 0xbd2   :  { %v1742_v34 = vadd.f32 %v1738_v41, %v1722_v33 }
 0xbd3   :  { %3324 = vtanh.f32 %v1741_v37  ;;  %v1857_v1 = vrot.slane %v1741_v37, 7 }
 0xbd4   :  { %3326 = vtanh.f32 %v1742_v34  ;;  %v1858_v26 = vrot.slane %v1742_v34, 7 }
 0xbdd   :  { %v3325_v36 = vpop.eup %3324 }
 0xbde   :  { %v3327_v39 = vpop.eup %3326  ;;  %1747 = vrot.lane.b32.xlu0 %v3325_v36, %s3438_s0 }
 0xbdf   :  { %1749 = vrot.lane.b32.xlu1 %v3327_v39, %s3438_s0 }
 0xc50   :  { %v1748_v62 = vpop.permute.xlu0 %1747 }
 0xc51   :  { %v1750_v51 = vpop.permute.xlu1 %1749  ;;  %v1753_v43 = vmul.f32 %v3321_v21, %v1748_v62 }
 0xc52   :  { %v1754_v44 = vmul.f32 %v3323_v22, %v1750_v51 }
 0xc53   :  { %v1757_v7 = vrot.slane %v1753_v43, 2 }
 0xc54   :  { %v1758_v24 = vrot.slane %v1754_v44, 1 }
 0xc56   :  { %v1759_v45 = vsel %vm681_vm6, %v1758_v24, %v1757_v7 }
 0xc57   :  { %1760 = vrot.lane.b32.xlu0 %v1759_v45, %s3439_s26 }
 0xcc9   :  { %v1761_v48 = vpop.permute.xlu0 %1760 }
 0xcca   :  { %3030 = vmatmul.mubr.msk.f32.vlgmr.msra.gmra.mrb[12].mxu1 %vm289_vm2, %v1761_v48 }
 0xccb   :  { %3191 = vmatpush3.bf16.msra.mxu1 %v3830_v9  ;;  %3051 = vmatprep.mubr.msk.f32.mxu1 %vm3436_vm0, %v3437_v16 }
 0xccc   :  { %3192 = vmatprep.subr.bf16.mxu1 %v3435_v6 }
 0xccf   :  { %3194 = vmatpush3.bf16.msra.mxu1 %v3834_v10 }
 0xcd0   :  { %3201 = vmatprep.subr.bf16.mxu1 %v3435_v6 }
 0xd9d   :  { %v1830_v47 = vpop.f32.mrb[12].mxu1 }
 0xd9e   :  { %v1835_v50 = vrot.slane %v1830_v47, 5  ;;  %v1836_v54 = vrot.slane %v1830_v47, 6  ;;  %v3031_v59 = vpop.f32.mrb[13].mxu1 }
 0xda0   :  { %v1839_v55 = vadd.f32 %v1835_v50, %v3870_v49  ;;  %v1840_v17 = vadd.f32 %v1836_v54, %v3868_v58 }
 0xda2   :  { %3328 = vtanh.f32 %v1839_v55  ;;  %v2777_v60 = vmul.f32 -1.442695, %v1839_v55  ;;  %v2778_v20 = vmul.f32 -1.442695, %v1840_v17 }
 0xda3   :  { %3330 = vtanh.f32 %v1840_v17 }
 0xda4   :  { %3332 = vpow2.f32 %v2777_v60 }
 0xda5   :  { %3334 = vpow2.f32 %v2778_v20 }
 0xdac   :  { %v3329_v14 = vpop.eup %3328 }
 0xdad   :  { %v3331_v57 = vpop.eup %3330  ;;  %1865 = vrot.lane.b32.xlu1 %v3329_v14, %s3438_s0 }
 0xdae   :  { %1867 = vrot.lane.b32.xlu0 %v3331_v57, %s3438_s0  ;;  %v3333_v13 = vpop.eup %3332 }
 0xdaf   :  { %v3335_v42 = vpop.eup %3334  ;;  %v1847_v27 = vadd.f32 1.0, %v3333_v13 }
 0xdb0   :  { %v1848_v12 = vadd.f32 1.0, %v3335_v42 }
 0xdb1   :  { %3336 = vrcp.f32 %v1847_v27 }
 0xdb2   :  { %3338 = vrcp.f32 %v1848_v12 }
 0xdbb   :  { %v3337_v8 = vpop.eup %3336 }
 0xdbc   :  { %v3339_v2 = vpop.eup %3338  ;;  %v1861_v3 = vmul.f32 %v3337_v8, %v1857_v1 }
 0xdbd   :  { %v1862_v5 = vmul.f32 %v3339_v2, %v1858_v26 }
 0xe1f   :  { %v1866_v56 = vpop.permute.xlu1 %1865 }
 0xe20   :  { %v1868_v61 = vpop.permute.xlu0 %1867  ;;  %v1871_v40 = vmul.f32 %v3337_v8, %v1866_v56 }
 0xe21   :  { %v1872_v0 = vmul.f32 %v3339_v2, %v1868_v61 }
 0xe22   :  { %1875 = vrot.lane.b32.xlu1 %v1871_v40, %s3438_s0 }
 0xe23   :  { %1877 = vrot.lane.b32.xlu0 %v1872_v0, %s3438_s0 }
 0xe94   :  { %v1876_v23 = vpop.permute.xlu1 %1875 }
 0xe95   :  { %v1878_v31 = vpop.permute.xlu0 %1877  ;;  %v1881_v32 = vadd.f32 %v1876_v23, %v1861_v3 }
 0xe96   :  { %v1882_v18 = vadd.f32 %v1878_v31, %v1862_v5 }
 0xe97   :  { %3340 = vtanh.f32 %v1881_v32  ;;  %v1997_v59 = vrot.slane %v1881_v32, 7 }
 0xe98   :  { %3342 = vtanh.f32 %v1882_v18  ;;  %v1998_v55 = vrot.slane %v1882_v18, 7 }
 0xea1   :  { %v3341_v19 = vpop.eup %3340 }
 0xea2   :  { %v3343_v29 = vpop.eup %3342  ;;  %1887 = vrot.lane.b32.xlu1 %v3341_v19, %s3438_s0 }
 0xea3   :  { %1889 = vrot.lane.b32.xlu0 %v3343_v29, %s3438_s0 }
 0xf14   :  { %v1888_v53 = vpop.permute.xlu1 %1887 }
 0xf15   :  { %v1890_v21 = vpop.permute.xlu0 %1889  ;;  %v1893_v38 = vmul.f32 %v3337_v8, %v1888_v53 }
 0xf16   :  { %v1894_v22 = vmul.f32 %v3339_v2, %v1890_v21 }
 0xf17   :  { %v1897_v11 = vrot.slane %v1893_v38, 3 }
 0xf18   :  { %v1898_v63 = vrot.slane %v1894_v22, 2 }
 0xf1a   :  { %v1899_v4 = vsel %vm681_vm6, %v1898_v63, %v1897_v11 }
 0xf1b   :  { %1900 = vrot.lane.b32.xlu1 %v1899_v4, %s3439_s26 }
 0xf8d   :  { %v1901_v52 = vpop.permute.xlu1 %1900 }
 0xf8e   :  { %3041 = vmatmul.mubr.msk.f32.vlgmr.msra.gmra.mrb[22].mxu0 %vm289_vm2, %v1901_v52 }
 0xf8f   :  { %3197 = vmatpush3.bf16.msra.mxu0 %v3830_v9  ;;  %3062 = vmatprep.mubr.msk.f32.mxu0 %vm3436_vm0, %v3437_v16 }
 0xf90   :  { %3198 = vmatprep.subr.bf16.mxu0 %v3435_v6 }
 0xf93   :  { %3200 = vmatpush3.bf16.msra.mxu0 %v3834_v10 }
 0xf94   :  { %3207 = vmatprep.subr.bf16.mxu0 %v3435_v6 }
0x1061   :  { %v1970_v25 = vpop.f32.mrb[22].mxu0 }
0x1062   :  { %v1975_v30 = vrot.slane %v1970_v25, 4  ;;  %v1976_v33 = vrot.slane %v1970_v25, 5  ;;  %v3042_v46 = vpop.f32.mrb[23].mxu0 }
0x1064   :  { %v1979_v41 = vadd.f32 %v1975_v30, %v3870_v49  ;;  %v1980_v37 = vadd.f32 %v1976_v33, %v3868_v58 }
0x1066   :  { %3344 = vtanh.f32 %v1979_v41  ;;  %v2780_v39 = vmul.f32 -1.442695, %v1979_v41  ;;  %v2781_v62 = vmul.f32 -1.442695, %v1980_v37 }
0x1067   :  { %3346 = vtanh.f32 %v1980_v37 }
0x1068   :  { %3348 = vpow2.f32 %v2780_v39 }
0x1069   :  { %3350 = vpow2.f32 %v2781_v62 }
0x1070   :  { %v3345_v34 = vpop.eup %3344 }
0x1071   :  { %v3347_v36 = vpop.eup %3346  ;;  %2005 = vrot.lane.b32.xlu0 %v3345_v34, %s3438_s0 }
0x1072   :  { %2007 = vrot.lane.b32.xlu1 %v3347_v36, %s3438_s0  ;;  %v3349_v51 = vpop.eup %3348 }
0x1073   :  { %v3351_v43 = vpop.eup %3350  ;;  %v1987_v44 = vadd.f32 1.0, %v3349_v51 }
0x1074   :  { %v1988_v7 = vadd.f32 1.0, %v3351_v43 }
0x1075   :  { %3352 = vrcp.f32 %v1987_v44 }
0x1076   :  { %3354 = vrcp.f32 %v1988_v7 }
0x107f   :  { %v3353_v24 = vpop.eup %3352 }
0x1080   :  { %v3355_v48 = vpop.eup %3354  ;;  %v2001_v17 = vmul.f32 %v3353_v24, %v1997_v59 }
0x1081   :  { %v2002_v14 = vmul.f32 %v3355_v48, %v1998_v55 }
0x10e3   :  { %v2006_v45 = vpop.permute.xlu0 %2005 }
0x10e4   :  { %v2008_v47 = vpop.permute.xlu1 %2007  ;;  %v2011_v50 = vmul.f32 %v3353_v24, %v2006_v45 }
0x10e5   :  { %v2012_v54 = vmul.f32 %v3355_v48, %v2008_v47 }
0x10e6   :  { %2015 = vrot.lane.b32.xlu0 %v2011_v50, %s3438_s0 }
0x10e7   :  { %2017 = vrot.lane.b32.xlu1 %v2012_v54, %s3438_s0 }
0x1158   :  { %v2016_v57 = vpop.permute.xlu0 %2015 }
0x1159   :  { %v2018_v60 = vpop.permute.xlu1 %2017  ;;  %v2021_v20 = vadd.f32 %v2016_v57, %v2001_v17 }
0x115a   :  { %v2022_v13 = vadd.f32 %v2018_v60, %v2002_v14 }
0x115b   :  { %3356 = vtanh.f32 %v2021_v20  ;;  %v2137_v30 = vrot.slane %v2021_v20, 7 }
0x115c   :  { %3358 = vtanh.f32 %v2022_v13  ;;  %v2138_v33 = vrot.slane %v2022_v13, 7 }
0x1165   :  { %v3357_v42 = vpop.eup %3356 }
0x1166   :  { %v3359_v27 = vpop.eup %3358  ;;  %2027 = vrot.lane.b32.xlu0 %v3357_v42, %s3438_s0 }
0x1167   :  { %2029 = vrot.lane.b32.xlu1 %v3359_v27, %s3438_s0 }
0x11d8   :  { %v2028_v12 = vpop.permute.xlu0 %2027 }
0x11d9   :  { %v2030_v8 = vpop.permute.xlu1 %2029  ;;  %v2033_v56 = vmul.f32 %v3353_v24, %v2028_v12 }
0x11da   :  { %v2034_v2 = vmul.f32 %v3355_v48, %v2030_v8 }
0x11db   :  { %v2037_v61 = vrot.slane %v2033_v56, 4 }
0x11dc   :  { %v2038_v40 = vrot.slane %v2034_v2, 3 }
0x11de   :  { %v2039_v0 = vsel %vm681_vm6, %v2038_v40, %v2037_v61 }
0x11df   :  { %2040 = vrot.lane.b32.xlu0 %v2039_v0, %s3439_s26 }
0x1251   :  { %v2041_v1 = vpop.permute.xlu0 %2040 }
0x1252   :  { %3052 = vmatmul.mubr.msk.f32.vlgmr.msra.gmra.mrb[14].mxu1 %vm289_vm2, %v2041_v1 }
0x1253   :  { %3203 = vmatpush3.bf16.msra.mxu1 %v3830_v9  ;;  %3073 = vmatprep.mubr.msk.f32.mxu1 %vm3436_vm0, %v3437_v16 }
0x1254   :  { %3204 = vmatprep.subr.bf16.mxu1 %v3435_v6 }
0x1257   :  { %3206 = vmatpush3.bf16.msra.mxu1 %v3834_v10 }
0x1258   :  { %3213 = vmatprep.subr.bf16.mxu1 %v3435_v6 }
0x1325   :  { %v2110_v26 = vpop.f32.mrb[14].mxu1 }
0x1326   :  { %v2115_v3 = vrot.slane %v2110_v26, 3  ;;  %v2116_v5 = vrot.slane %v2110_v26, 4  ;;  %v3053_v23 = vpop.f32.mrb[15].mxu1 }
0x1328   :  { %v2119_v31 = vadd.f32 %v2115_v3, %v3870_v49  ;;  %v2120_v32 = vadd.f32 %v2116_v5, %v3868_v58 }
0x132a   :  { %3360 = vtanh.f32 %v2119_v31  ;;  %v2783_v19 = vmul.f32 -1.442695, %v2119_v31  ;;  %v2784_v10 = vmul.f32 -1.442695, %v2120_v32 }
0x132b   :  { %3362 = vtanh.f32 %v2120_v32 }
0x132c   :  { %3364 = vpow2.f32 %v2783_v19 }
0x132d   :  { %3366 = vpow2.f32 %v2784_v10 }
0x1334   :  { %v3361_v9 = vpop.eup %3360 }
0x1335   :  { %v3363_v18 = vpop.eup %3362  ;;  %2145 = vrot.lane.b32.xlu1 %v3361_v9, %s3438_s0 }
0x1336   :  { %2147 = vrot.lane.b32.xlu0 %v3363_v18, %s3438_s0  ;;  %v3365_v29 = vpop.eup %3364 }
0x1337   :  { %v3367_v53 = vpop.eup %3366  ;;  %v2127_v21 = vadd.f32 1.0, %v3365_v29 }
0x1338   :  { %v2128_v38 = vadd.f32 1.0, %v3367_v53 }
0x1339   :  { %3368 = vrcp.f32 %v2127_v21 }
0x133a   :  { %3370 = vrcp.f32 %v2128_v38 }
0x1343   :  { %v3369_v22 = vpop.eup %3368 }
0x1344   :  { %v3371_v63 = vpop.eup %3370  ;;  %v2141_v46 = vmul.f32 %v3369_v22, %v2137_v30 }
0x1345   :  { %v2142_v41 = vmul.f32 %v3371_v63, %v2138_v33  ;;  %v2457_v33 = vld [vmem:[#allocation2 + $0xb8] sm:$0xff] }
0x13a7   :  { %v2146_v11 = vpop.permute.xlu1 %2145 }
0x13a8   :  { %v2148_v4 = vpop.permute.xlu0 %2147  ;;  %v2151_v52 = vmul.f32 %v3369_v22, %v2146_v11 }
0x13a9   :  { %v2152_v25 = vmul.f32 %v3371_v63, %v2148_v4 }
0x13aa   :  { %2155 = vrot.lane.b32.xlu1 %v2151_v52, %s3438_s0  ;;  %v2455_v52 = vld [vmem:[#allocation2 + $0xa8] sm:$0xff] }
0x13ab   :  { %2157 = vrot.lane.b32.xlu0 %v2152_v25, %s3438_s0  ;;  %v2456_v25 = vld [vmem:[#allocation2 + $0xb0] sm:$0xff] }
0x13ac   :  { %v3214_v30 = vpack.c.bf16 %v2456_v25, %v2455_v52 }
0x141c   :  { %v2156_v37 = vpop.permute.xlu1 %2155 }
0x141d   :  { %v2158_v34 = vpop.permute.xlu0 %2157  ;;  %v2161_v36 = vadd.f32 %v2156_v37, %v2141_v46  ;;  %v2458_v46 = vld [vmem:[#allocation2 + $0xc0] sm:$0xff] }
0x141e   :  { %v2162_v39 = vadd.f32 %v2158_v34, %v2142_v41  ;;  %v3217_v37 = vpack.c.bf16 %v2458_v46, %v2457_v33  ;;  %v2459_v34 = vld [vmem:[#allocation2 + $0xc8] sm:$0xff]  ;;  %v2629_v33 = vld [vmem:[#allocation2 + $0x110] sm:$0xff] }
0x141f   :  { %3372 = vtanh.f32 %v2161_v36  ;;  %v2277_v3 = vrot.slane %v2161_v36, 7  ;;  %v2460_v36 = vld [vmem:[#allocation2 + $0xd0] sm:$0xff] }
0x1420   :  { %3374 = vtanh.f32 %v2162_v39  ;;  %v2278_v5 = vrot.slane %v2162_v39, 7  ;;  %v3220_v39 = vpack.c.bf16 %v2460_v36, %v2459_v34  ;;  %v2793_v36 = vld [vmem:[#allocation2 + $0x130] ss:$0 sm:$0xff] }
0x1429   :  { %v3373_v62 = vpop.eup %3372 }
0x142a   :  { %v3375_v51 = vpop.eup %3374  ;;  %2167 = vrot.lane.b32.xlu1 %v3373_v62, %s3438_s0  ;;  %v2461_v62 = vld [vmem:[#allocation2 + $0xd8] sm:$0xff] }
0x142b   :  { %2169 = vrot.lane.b32.xlu0 %v3375_v51, %s3438_s0  ;;  %v2462_v51 = vld [vmem:[#allocation2 + $0xe0] sm:$0xff] }
0x149c   :  { %v2168_v43 = vpop.permute.xlu1 %2167 }
0x149d   :  { %v2170_v44 = vpop.permute.xlu0 %2169  ;;  %v2173_v7 = vmul.f32 %v3369_v22, %v2168_v43  ;;  %v3223_v43 = vpack.c.bf16 %v2462_v51, %v2461_v62 }
0x149e   :  { %v2174_v24 = vmul.f32 %v3371_v63, %v2170_v44 }
0x149f   :  { %v2177_v45 = vrot.slane %v2173_v7, 5 }
0x14a0   :  { %v2178_v48 = vrot.slane %v2174_v24, 4 }
0x14a2   :  { %v2179_v47 = vsel %vm681_vm6, %v2178_v48, %v2177_v45 }
0x14a3   :  { %2180 = vrot.lane.b32.xlu1 %v2179_v47, %s3439_s26 }
0x1515   :  { %v2181_v50 = vpop.permute.xlu1 %2180 }
0x1516   :  { %3063 = vmatmul.mubr.msk.f32.vlgmr.msra.gmra.mrb[24].mxu0 %vm289_vm2, %v2181_v50 }
0x1517   :  { %3084 = vmatprep.mubr.msk.f32.mxu0 %vm3436_vm0, %v3437_v16 }
0x15e9   :  { %v2250_v54 = vpop.f32.mrb[24].mxu0 }
0x15ea   :  { %v2255_v59 = vrot.slane %v2250_v54, 2  ;;  %v2256_v55 = vrot.slane %v2250_v54, 3  ;;  %v3064_v17 = vpop.f32.mrb[25].mxu0 }
0x15ec   :  { %v2259_v14 = vadd.f32 %v2255_v59, %v3870_v49  ;;  %v2260_v57 = vadd.f32 %v2256_v55, %v3868_v58 }
0x15ee   :  { %3376 = vtanh.f32 %v2259_v14  ;;  %v2786_v13 = vmul.f32 -1.442695, %v2259_v14  ;;  %v2787_v42 = vmul.f32 -1.442695, %v2260_v57 }
0x15ef   :  { %3378 = vtanh.f32 %v2260_v57 }
0x15f0   :  { %3380 = vpow2.f32 %v2786_v13 }
0x15f1   :  { %3382 = vpow2.f32 %v2787_v42 }
0x15f8   :  { %v3377_v60 = vpop.eup %3376 }
0x15f9   :  { %v3379_v20 = vpop.eup %3378  ;;  %2285 = vrot.lane.b32.xlu0 %v3377_v60, %s3438_s0 }
0x15fa   :  { %2287 = vrot.lane.b32.xlu1 %v3379_v20, %s3438_s0  ;;  %v3381_v27 = vpop.eup %3380 }
0x15fb   :  { %v3383_v12 = vpop.eup %3382  ;;  %v2267_v8 = vadd.f32 1.0, %v3381_v27 }
0x15fc   :  { %v2268_v56 = vadd.f32 1.0, %v3383_v12 }
0x15fd   :  { %3384 = vrcp.f32 %v2267_v8 }
0x15fe   :  { %3386 = vrcp.f32 %v2268_v56 }
0x1607   :  { %v3385_v2 = vpop.eup %3384 }
0x1608   :  { %v3387_v40 = vpop.eup %3386  ;;  %v2281_v23 = vmul.f32 %v3385_v2, %v2277_v3  ;;  %v2463_v3 = vld [vmem:[#allocation2 + $0xe8] sm:$0xff] }
0x1609   :  { %v2282_v31 = vmul.f32 %v3387_v40, %v2278_v5  ;;  %v2464_v5 = vld [vmem:[#allocation2 + $0xf0] sm:$0xff] }
0x166b   :  { %v2286_v61 = vpop.permute.xlu0 %2285 }
0x166c   :  { %v2288_v0 = vpop.permute.xlu1 %2287  ;;  %v2291_v1 = vmul.f32 %v3385_v2, %v2286_v61 }
0x166d   :  { %v2292_v26 = vmul.f32 %v3387_v40, %v2288_v0 }
0x166e   :  { %2295 = vrot.lane.b32.xlu0 %v2291_v1, %s3438_s0 }
0x166f   :  { %2297 = vrot.lane.b32.xlu1 %v2292_v26, %s3438_s0 }
0x16e0   :  { %v2296_v32 = vpop.permute.xlu0 %2295 }
0x16e1   :  { %v2298_v9 = vpop.permute.xlu1 %2297  ;;  %v3979_v18 = vadd.f32 %v2296_v32, %v2281_v23  ;;  %v2465_v23 = vld [vmem:[#allocation2 + $0xf8] sm:$0xff]  ;;  %v2466_v32 = vld [vmem:[#allocation2 + $0x100] sm:$0xff] }
0x16e2   :  { %v3981_v19 = vadd.f32 %v2298_v9, %v2282_v31  ;;  %v3208_v31 = vpack.c.bf16 %v2464_v5, %v2463_v3 }
0x16e3   :  { %3388 = vtanh.f32 %v3979_v18  ;;  %v2417_v8 = vrot.slane %v3979_v18, 7  ;;  %v3211_v18 = vpack.c.bf16 %v2466_v32, %v2465_v23 }
0x16e4   :  { %3390 = vtanh.f32 %v3981_v19  ;;  %v2418_v56 = vrot.slane %v3981_v19, 7  ;;  %3209 = vmatpush3.bf16.msra.mxu0 %v3208_v31 }
0x16e5   :  { %3210 = vmatprep.subr.bf16.mxu0 %v3435_v6 }
0x16e8   :  { %3212 = vmatpush3.bf16.msra.mxu0 %v3211_v18 }
0x16e9   :  { %3225 = vmatprep.subr.bf16.mxu0 %v3435_v6 }
0x16ed   :  { %v3389_v10 = vpop.eup %3388 }
0x16ee   :  { %v3391_v29 = vpop.eup %3390  ;;  %2307 = vrot.lane.b32.xlu0 %v3389_v10, %s3438_s0 }
0x16ef   :  { %2309 = vrot.lane.b32.xlu1 %v3391_v29, %s3438_s0 }
0x1760   :  { %v2308_v53 = vpop.permute.xlu0 %2307 }
0x1761   :  { %v2310_v21 = vpop.permute.xlu1 %2309  ;;  %v2313_v38 = vmul.f32 %v3385_v2, %v2308_v53 }
0x1762   :  { %v2314_v22 = vmul.f32 %v3387_v40, %v2310_v21 }
0x1763   :  { %v2317_v11 = vrot.slane %v2313_v38, 6 }
0x1764   :  { %v2318_v63 = vrot.slane %v2314_v22, 5 }
0x1766   :  { %v2319_v4 = vsel %vm681_vm6, %v2318_v63, %v2317_v11 }
0x1767   :  { %2320 = vrot.lane.b32.xlu0 %v2319_v4, %s3439_s26 }
0x17d9   :  { %v2321_v41 = vpop.permute.xlu0 %2320 }
0x17da   :  { %3074 = vmatmul.mubr.msk.f32.vlgmr.msra.gmra.mrb[16].mxu1 %vm289_vm2, %v2321_v41  ;;  %v2630_v41 = vld [vmem:[#allocation2 + $0x118] sm:$0xff] }
0x17db   :  { %3215 = vmatpush3.bf16.msra.mxu1 %v3214_v30  ;;  %3103 = vmatprep.mubr.msk.f32.mxu1 %vm3436_vm0, %v3437_v16  ;;  %v2628_v30 = vld [vmem:[#allocation2 + $0x108] sm:$0xff] }
0x17dc   :  { %3216 = vmatprep.subr.bf16.mxu1 %v3435_v6  ;;  %v3226_v46 = vpack.c.bf16 %v2629_v33, %v2628_v30 }
0x17df   :  { %3218 = vmatpush3.bf16.msra.mxu1 %v3217_v37  ;;  %v2631_v37 = vld [vmem:[#allocation2 + $0x120] sm:$0xff] }
0x17e0   :  { %3219 = vmatprep.subr.bf16.mxu1 %v3435_v6 }
0x17e3   :  { %3221 = vmatpush3.bf16.msra.mxu1 %v3220_v39 }
0x17e4   :  { %3222 = vmatprep.subr.bf16.mxu1 %v3435_v6 }
0x17e7   :  { %3224 = vmatpush3.bf16.msra.mxu1 %v3223_v43  ;;  %v2794_v43 = vld [vmem:[#allocation2 + $0x131] ss:$0 sm:$0xff] }
0x17ea   :  { %3104 = vmatmul.mubr.msk.f32.vlgmr.msra.gmra.mrb[18].mxu1 %vm1037_vm9, %v3875_v28 }
0x18ad   :  { %v2390_v44 = vpop.f32.mrb[16].mxu1 }
0x18ae   :  { %v2395_v7 = vrot.slane %v2390_v44, 1  ;;  %v2396_v24 = vrot.slane %v2390_v44, 2  ;;  %v3075_v45 = vpop.f32.mrb[17].mxu1 }
0x18b0   :  { %v2399_v48 = vadd.f32 %v2395_v7, %v3870_v49  ;;  %v2400_v47 = vadd.f32 %v2396_v24, %v3868_v58 }
0x18b2   :  { %3392 = vtanh.f32 %v2399_v48  ;;  %v2789_v28 = vmul.f32 -1.442695, %v2399_v48  ;;  %v2790_v17 = vmul.f32 -1.442695, %v2400_v47 }
0x18b3   :  { %3394 = vtanh.f32 %v2400_v47 }
0x18b4   :  { %3396 = vpow2.f32 %v2789_v28 }
0x18b5   :  { %3398 = vpow2.f32 %v2790_v17 }
0x18bc   :  { %v3393_v50 = vpop.eup %3392 }
0x18bd   :  { %v3395_v54 = vpop.eup %3394  ;;  %v3999_v59 = vpop.f32.mrb[18].mxu1  ;;  %2425 = vrot.lane.b32.xlu1 %v3393_v50, %s3438_s0 }
0x18be   :  { %2427 = vrot.lane.b32.xlu0 %v3395_v54, %s3438_s0  ;;  %v3105_v55 = vpop.f32.mrb[19].mxu1  ;;  %v3397_v14 = vpop.eup %3396 }
0x18bf   :  { %v3399_v57 = vpop.eup %3398  ;;  %v2407_v49 = vadd.f32 1.0, %v3397_v14 }
0x18c0   :  { %v2408_v60 = vadd.f32 1.0, %v3399_v57 }
0x18c1   :  { %3400 = vrcp.f32 %v2407_v49 }
0x18c2   :  { %3402 = vrcp.f32 %v2408_v60 }
0x18cb   :  { %v3401_v58 = vpop.eup %3400 }
0x18cc   :  { %v3403_v13 = vpop.eup %3402  ;;  %v2421_v2 = vmul.f32 %v3401_v58, %v2417_v8 }
0x18cd   :  { %v2422_v61 = vmul.f32 %v3403_v13, %v2418_v56 }
0x192f   :  { %v2426_v20 = vpop.permute.xlu1 %2425 }
0x1930   :  { %v2428_v42 = vpop.permute.xlu0 %2427  ;;  %v2431_v27 = vmul.f32 %v3401_v58, %v2426_v20 }
0x1931   :  { %v2432_v12 = vmul.f32 %v3403_v13, %v2428_v42 }
0x1932   :  { %2435 = vrot.lane.b32.xlu1 %v2431_v27, %s3438_s0 }
0x1933   :  { %2437 = vrot.lane.b32.xlu0 %v2432_v12, %s3438_s0 }
0x19a4   :  { %v2436_v40 = vpop.permute.xlu1 %2435 }
0x19a5   :  { %v2438_v0 = vpop.permute.xlu0 %2437  ;;  %v2441_v1 = vadd.f32 %v2436_v40, %v2421_v2 }
0x19a6   :  { %v2442_v26 = vadd.f32 %v2438_v0, %v2422_v61 }
0x19a7   :  { %3404 = vtanh.f32 %v2441_v1 }
0x19a8   :  { %3406 = vtanh.f32 %v2442_v26 }
0x19b1   :  { %v3405_v9 = vpop.eup %3404 }
0x19b2   :  { %v3407_v10 = vpop.eup %3406  ;;  %2447 = vrot.lane.b32.xlu1 %v3405_v9, %s3438_s0 }
0x19b3   :  { %2449 = vrot.lane.b32.xlu0 %v3407_v10, %s3438_s0 }
0x1a24   :  { %v2448_v19 = vpop.permute.xlu1 %2447 }
0x1a25   :  { %v2450_v29 = vpop.permute.xlu0 %2449  ;;  %v2453_v53 = vmul.f32 %v3401_v58, %v2448_v19 }
0x1a26   :  { %v2454_v21 = vmul.f32 %v3403_v13, %v2450_v29 }
0x1a27   :  { %v2469_v38 = vrot.slane %v2453_v53, 7 }
0x1a28   :  { %v2470_v22 = vrot.slane %v2454_v21, 6 }
0x1a2a   :  { %v2471_v11 = vsel %vm681_vm6, %v2470_v22, %v2469_v38  ;;  %vm2710_vm6 = vcmask 1041408  }
0x1a2b   :  { %2472 = vrot.lane.b32.xlu1 %v2471_v11, %s3439_s26 }
0x1a2f   :  { %2715 = vrot.lane.b32.xlu1 %v3437_v16, %s3440_s27 }
0x1a9d   :  { %v2473_v63 = vpop.permute.xlu1 %2472 }
0x1a9e   :  { %3085 = vmatmul.mubr.msk.f32.vlgmr.msra.gmra.mrb[26].mxu0 %vm289_vm2, %v2473_v63 }
0x1a9f   :  { %3114 = vmatprep.mubr.msk.f32.mxu0 %vm3436_vm0, %v3437_v16  ;;  %3227 = vmatpush3.bf16.msra.mxu0 %v3226_v46  ;;  %v3229_v16 = vpack.c.bf16 %v2631_v37, %v2630_v41 }
0x1aa0   :  { %3228 = vmatprep.subr.bf16.mxu0 %v3435_v6 }
0x1aa1   :  { %v2716_v4 = vpop.permute.xlu1 %2715 }
0x1aa2   :  { %v2720_v52 = vsel %vm1143_vm14, %v3851_v15, %v2716_v4 }
0x1aa3   :  { %v2723_v25 = vsel %vm2721_vm1, %v2720_v52, 0.0  ;;  %3230 = vmatpush3.bf16.msra.mxu0 %v3229_v16 }
0x1aa4   :  { %2725 = vst [vmem:[%s4036_s2 + $0x8] sm:$0xff] %v2723_v25 }
0x1b71   :  { %v2542_v34 = vpop.f32.mrb[26].mxu0 }
0x1b72   :  { %v2618_v15 = vadd.f32 %v3999_v59, %v2542_v34  ;;  %v3086_v39 = vpop.f32.mrb[27].mxu0 }
0x1b74   :  { %v2626_v62 = vadd.f32 %v2793_v36, %v2618_v15 }
0x1b76   :  { %v2627_v51 = vmax.f32 %v2626_v62, 0.0 }
0x1b78   :  { %3115 = vmatmul.mubr.msk.f32.vlgmr.msra.gmra.mrb[28].mxu0 %vm289_vm2, %v2627_v51 }
0x1c4b   :  { %v2706_v44 = vpop.f32.mrb[28].mxu0 }
0x1c4c   :  { %v2707_v7 = vadd.f32 %v2794_v43, %v2706_v44  ;;  %v3116_v24 = vpop.f32.mrb[29].mxu0 }
0x1c4e   :  { %v2711_v45 = vsel %vm2710_vm6, %v2707_v7, 0.0 }
0x1c4f   :  { %2713 = vrot.lane.b32.xlu0 %v2711_v45, %s3440_s27 }
0x1cc1   :  { %v2714_v6 = vpop.permute.xlu0 %2713 }
0x1cc2   :  { %v2719_v48 = vsel %vm1143_vm14, %v3847_v35, %v2714_v6 }
0x1cc3   :  { %v2722_v47 = vsel %vm2721_vm1, %v2719_v48, 0.0 }
0x1cc4   :  { %2724 = vst [vmem:[%s4036_s2] sm:$0xff] %v2722_v47 }
0x1cc5   :  { %2730 = vsyncpa [#allocation3], 1 }

</bundles_post_ra>
